<compile_context>
chip_gen: v6e
topology: v6e:2x2x1
jax: 0.10.0
libtpu: 0.0.40
codegen_flags: <defaults>
</compile_context>

<pallas_src>
import functools

import jax
import jax.numpy as jnp
from jax.experimental import pallas as pl
from jax.experimental.pallas import tpu as pltpu

LANE = 128       # TPU lane width
_NEG = -1e30     # mask value for padded logit lanes (exp underflows to 0)


def _round_up(n, m):
    return ((n + m - 1) // m) * m


def _softplus(x):
    # matches torch.log(1 + torch.exp(rho)) used by Linear_BBB
    return jnp.log(1.0 + jnp.exp(x))


# ----------------------------- Pallas kernel ------------------------------- #
def _bbb_mlp_kernel(
    x_ref,
    w1_mu, w1_rho, b1_mu, b1_rho,
    w2_mu, w2_rho, b2_mu, b2_rho,
    w3_mu, w3_rho, b3_mu, b3_rho,
    eps_w1, eps_b1, eps_w2, eps_b2, eps_w3, eps_b3,
    logp_ref, logits_ref,
    sig_w1, sig_b1, sig_w2, sig_b2, sig_w3, sig_b3,
    *, out_dim, compute_dtype):
    """One MC sample per grid step: in-kernel reparameterization + 3-layer MLP
    + log_softmax.  All feature dims are padded to multiples of 128 (lane-dense).
    sigma = softplus(rho) is sample-invariant and cached in VMEM scratch at the
    first grid step (requires the sample axis to be "arbitrary": all steps on
    one core so the scratch written at step 0 is visible to later steps)."""

    @pl.when(pl.program_id(0) == 0)
    def _():
        # Hoisted loop-invariant EUP work: exp+log over all weight/bias elems.
        sig_w1[...] = _softplus(w1_rho[...])
        sig_b1[...] = _softplus(b1_rho[...])
        sig_w2[...] = _softplus(w2_rho[...])
        sig_b2[...] = _softplus(b2_rho[...])
        sig_w3[...] = _softplus(w3_rho[...])
        sig_b3[...] = _softplus(b3_rho[...])

    x = x_ref[...]                                     # (B, D_pad)

    # w = mu + softplus(rho) * eps   (sigma read from scratch; VPU-only now)
    w1 = w1_mu[...] + sig_w1[...] * eps_w1[0]          # (D_pad, H_pad)
    b1 = b1_mu[...] + sig_b1[...] * eps_b1[0]          # (1, H_pad)
    w2 = w2_mu[...] + sig_w2[...] * eps_w2[0]          # (H_pad, H_pad)
    b2 = b2_mu[...] + sig_b2[...] * eps_b2[0]          # (1, H_pad)
    w3 = w3_mu[...] + sig_w3[...] * eps_w3[0]          # (H_pad, O_pad)
    b3 = b3_mu[...] + sig_b3[...] * eps_b3[0]          # (1, O_pad)

    def mm(a, w):
        return jnp.dot(a.astype(compute_dtype), w.astype(compute_dtype),
                       preferred_element_type=jnp.float32)

    h1 = jnp.maximum(mm(x, w1) + b1, 0.0)              # relu
    h2 = jnp.maximum(mm(h1, w2) + b2, 0.0)             # relu
    logits = mm(h2, w3) + b3                           # (B, O_pad); padded lanes = 0

    logits_ref[0] = logits                             # second output: logit=True is free

    # log_softmax over the REAL out_dim lanes only; padded lanes masked off.
    lane = jax.lax.broadcasted_iota(jnp.int32, logits.shape, 1)
    masked = jnp.where(lane < out_dim, logits, _NEG)
    m = jnp.max(masked, axis=1, keepdims=True)
    shifted = masked - m
    lse = jnp.log(jnp.sum(jnp.exp(shifted), axis=1, keepdims=True))
    logp_ref[0] = shifted - lse


def bbb_mlp_forward_mc(x_pad, params_pad, eps_pad, out_dim,
                       *, compute_dtype=jnp.float32):
    """Run all S Bayesian samples in one pallas_call.  Returns padded
    (S, B, O_pad) logp and logits."""
    w1m, w1r, b1m, b1r = params_pad["h1"]
    w2m, w2r, b2m, b2r = params_pad["h2"]
    w3m, w3r, b3m, b3r = params_pad["out"]
    ew1, eb1 = eps_pad["h1"]
    ew2, eb2 = eps_pad["h2"]
    ew3, eb3 = eps_pad["out"]

    S = ew1.shape[0]
    B = x_pad.shape[0]
    Op = w3m.shape[1]

    def resident(a):        # constant block index -> stays resident across samples
        return pl.BlockSpec(a.shape, lambda s: (0, 0))

    def per_sample(a):      # (S, r, c): stream sample s's block each grid step
        return pl.BlockSpec((1,) + a.shape[1:], lambda s: (s, 0, 0))

    in_specs = [resident(x_pad),
                resident(w1m), resident(w1r), resident(b1m), resident(b1r),
                resident(w2m), resident(w2r), resident(b2m), resident(b2r),
                resident(w3m), resident(w3r), resident(b3m), resident(b3r),
                per_sample(ew1), per_sample(eb1),
                per_sample(ew2), per_sample(eb2),
                per_sample(ew3), per_sample(eb3)]

    out_specs = [pl.BlockSpec((1, B, Op), lambda s: (s, 0, 0)),
                 pl.BlockSpec((1, B, Op), lambda s: (s, 0, 0))]
    out_shape = [jax.ShapeDtypeStruct((S, B, Op), jnp.float32),
                 jax.ShapeDtypeStruct((S, B, Op), jnp.float32)]

    # VMEM scratch for the sample-invariant sigma = softplus(rho) tensors.
    scratch_shapes = [pltpu.VMEM(w1m.shape, jnp.float32),
                      pltpu.VMEM(b1m.shape, jnp.float32),
                      pltpu.VMEM(w2m.shape, jnp.float32),
                      pltpu.VMEM(b2m.shape, jnp.float32),
                      pltpu.VMEM(w3m.shape, jnp.float32),
                      pltpu.VMEM(b3m.shape, jnp.float32)]

    kernel = functools.partial(_bbb_mlp_kernel, out_dim=out_dim,
                               compute_dtype=compute_dtype)

    grid_spec = pltpu.PrefetchScalarGridSpec(
        num_scalar_prefetch=0,
        grid=(S,),
        in_specs=in_specs,
        out_specs=out_specs,
        scratch_shapes=scratch_shapes)

    logp_pad, logits_pad = pl.pallas_call(
        kernel,
        grid_spec=grid_spec,
        out_shape=out_shape,
        compiler_params=pltpu.CompilerParams(
            # "arbitrary": sigma scratch initialized at step 0 must be visible
            # to every later sample step (single-core sequential execution).
            dimension_semantics=("arbitrary",)),
    )(x_pad,
      w1m, w1r, b1m, b1r, w2m, w2r, b2m, b2r, w3m, w3r, b3m, b3r,
      ew1, eb1, ew2, eb2, ew3, eb3)
    return logp_pad, logits_pad


# ------------------------- parameter setup (glue) --------------------------- #
def init_bbb_linear(key, in_dim, out_dim):
    """Deterministic Linear_BBB params: mu, rho for weight (out,in) and bias (out,)."""
    k_wmu, k_wrho, k_bmu, k_brho = jax.random.split(key, 4)
    w_mu = jax.random.uniform(k_wmu, (out_dim, in_dim), jnp.float32, -0.2, 0.2)
    w_rho = jax.random.uniform(k_wrho, (out_dim, in_dim), jnp.float32, -5.0, -4.0)
    b_mu = jax.random.uniform(k_bmu, (out_dim,), jnp.float32, -0.2, 0.2)
    b_rho = jax.random.uniform(k_brho, (out_dim,), jnp.float32, -5.0, -4.0)
    return w_mu, w_rho, b_mu, b_rho


def _sample_eps(key, layer_params, num_samples):
    """eps ~ N(0,1), torch layout: dict name -> (eps_w (S,out,in), eps_b (S,out))."""
    def one_sample(k):
        k1, k2, k3 = jax.random.split(k, 3)
        out = {}
        for name, kk in (("h1", k1), ("h2", k2), ("out", k3)):
            w_mu, _, b_mu, _ = layer_params[name]
            kw, kb = jax.random.split(kk)
            out[name] = (jax.random.normal(kw, w_mu.shape, jnp.float32),
                         jax.random.normal(kb, b_mu.shape, jnp.float32))
        return out
    keys = jax.random.split(key, num_samples)
    return jax.vmap(one_sample)(keys)


def _prep_params(layer_params, in_dim, hidden_dim, out_dim):
    """Transpose torch-layout (out,in) mu/rho to (in,out) and zero-pad feature
    dims to multiples of 128 (lane-dense)."""
    Dp = _round_up(in_dim, LANE)
    Hp = _round_up(hidden_dim, LANE)
    Op = _round_up(out_dim, LANE)

    def prep(params, rows_p, cols_p):
        w_mu, w_rho, b_mu, b_rho = params

        def pad_w(w):
            wt = w.T   # (in, out)
            return jnp.pad(wt, ((0, rows_p - wt.shape[0]), (0, cols_p - wt.shape[1])))

        def pad_b(b):
            return jnp.pad(b.reshape(1, -1), ((0, 0), (0, cols_p - b.shape[0])))

        return pad_w(w_mu), pad_w(w_rho), pad_b(b_mu), pad_b(b_rho)

    padded = {"h1": prep(layer_params["h1"], Dp, Hp),
              "h2": prep(layer_params["h2"], Hp, Hp),
              "out": prep(layer_params["out"], Hp, Op)}
    return padded, (Dp, Hp, Op)


def _prep_eps(eps, Dp, Hp, Op):
    def pad_w(e, rows_p, cols_p):
        et = jnp.swapaxes(e, 1, 2)   # (S, in, out)
        return jnp.pad(et, ((0, 0), (0, rows_p - et.shape[1]), (0, cols_p - et.shape[2])))

    def pad_b(e, cols_p):
        eb = e[:, None, :]           # (S, 1, out)
        return jnp.pad(eb, ((0, 0), (0, 0), (0, cols_p - eb.shape[2])))

    return {"h1": (pad_w(eps["h1"][0], Dp, Hp), pad_b(eps["h1"][1], Hp)),
            "h2": (pad_w(eps["h2"][0], Hp, Hp), pad_b(eps["h2"][1], Hp)),
            "out": (pad_w(eps["out"][0], Hp, Op), pad_b(eps["out"][1], Op))}


def classifier_bbb_forward(x_nchw, layer_params, sample_key, imsize, out_dim,
                           num_samples=1, logit=False,
                           compute_dtype=jnp.float32):
    """Equivalent of Classifier_BBB.forward, run for num_samples MC weight samples
    inside a single Pallas call.  num_samples=1 reproduces module.forward."""
    B = x_nchw.shape[0]
    in_dim = imsize * imsize
    hidden_dim = layer_params["h1"][0].shape[0]

    x_flat = x_nchw.reshape(B, in_dim).astype(jnp.float32)

    params_pad, (Dp, Hp, Op) = _prep_params(layer_params, in_dim, hidden_dim, out_dim)
    x_pad = jnp.pad(x_flat, ((0, 0), (0, Dp - in_dim)))

    eps = _sample_eps(sample_key, layer_params, num_samples)
    eps_pad = _prep_eps(eps, Dp, Hp, Op)

    logp_pad, logits_pad = bbb_mlp_forward_mc(
        x_pad, params_pad, eps_pad, out_dim, compute_dtype=compute_dtype)

    logp = logp_pad[:, :, :out_dim]
    logits = logits_pad[:, :, :out_dim]
    if num_samples == 1:
        logp, logits = logp[0], logits[0]
    if logit:
        return logp, logits
    return logp


# ------------------------------- reference ---------------------------------- #
def _reference_forward(x_flat, layer_params, eps_s):
    """Pure-JAX reference for one MC sample (same eps, torch layout)."""
    def lin(x, params, eps):
        w_mu, w_rho, b_mu, b_rho = params
        ew, eb = eps
        w = w_mu + _softplus(w_rho) * ew      # (out, in)
        b = b_mu + _softplus(b_rho) * eb      # (out,)
        return x @ w.T + b

    h1 = jnp.maximum(lin(x_flat, layer_params["h1"], eps_s["h1"]), 0.0)
    h2 = jnp.maximum(lin(h1, layer_params["h2"], eps_s["h2"]), 0.0)
    logits = lin(h2, layer_params["out"], eps_s["out"])
    m = jnp.max(logits, axis=1, keepdims=True)
    shifted = logits - m
    logp = shifted - jnp.log(jnp.sum(jnp.exp(shifted), axis=1, keepdims=True))
    return logp, logits


if __name__ == "__main__":
    # shapes consistent with the module: imsize=16 -> in_dim=256, hidden=32, out=10
    imsize = 16
    in_dim = imsize * imsize
    hidden_dim = 32
    out_dim = 10
    batch = 8
    num_samples = 4

    root = jax.random.PRNGKey(0)
    k_x, k_h1, k_h2, k_out, k_sample = jax.random.split(root, 5)

    x = jax.random.normal(k_x, (batch, 1, imsize, imsize), jnp.float32)  # NCHW

    layer_params = {
        "h1": init_bbb_linear(k_h1, in_dim, hidden_dim),
        "h2": init_bbb_linear(k_h2, hidden_dim, hidden_dim),
        "out": init_bbb_linear(k_out, hidden_dim, out_dim),
    }

    # all MC samples in one fused kernel; logits come out for free
    logp, logits = classifier_bbb_forward(
        x, layer_params, k_sample, imsize, out_dim,
        num_samples=num_samples, logit=True)
    logp, logits = jax.block_until_ready((logp, logits))

    assert logp.shape == (num_samples, batch, out_dim)
    assert logits.shape == (num_samples, batch, out_dim)

    # correctness check vs pure-JAX reference using the identical eps stream
    eps = _sample_eps(k_sample, layer_params, num_samples)
    x_flat = x.reshape(batch, -1)
    for s in range(num_samples):
        eps_s = {n: (eps[n][0][s], eps[n][1][s]) for n in ("h1", "h2", "out")}
        ref_logp, ref_logits = _reference_forward(x_flat, layer_params, eps_s)
        assert jnp.allclose(logp[s], ref_logp, atol=1e-4, rtol=1e-4), \
            f"log_softmax mismatch at sample {s}"
        assert jnp.allclose(logits[s], ref_logits, atol=1e-4, rtol=1e-4), \
            f"logits mismatch at sample {s}"
        assert jnp.allclose(jnp.exp(logp[s]).sum(axis=1), 1.0, atol=1e-5)

    # single-sample path == module.forward(x) signature (returns (B, out_dim))
    logp1 = classifier_bbb_forward(x, layer_params, k_sample, imsize, out_dim,
                                   num_samples=1, logit=False)
    logp1 = jax.block_until_ready(logp1)
    assert logp1.shape == (batch, out_dim)

    print("KERNEL_OK")
</pallas_src>

<mosaic_0001>
module attributes {stable_mosaic.version = 11 : i64} {
  func.func @_bbb_mlp_kernel(%arg0: i32, %arg1: memref<8x256xf32, #tpu.memory_space<vmem>>, %arg2: memref<256x128xf32, #tpu.memory_space<vmem>>, %arg3: memref<256x128xf32, #tpu.memory_space<vmem>>, %arg4: memref<1x128xf32, #tpu.memory_space<vmem>>, %arg5: memref<1x128xf32, #tpu.memory_space<vmem>>, %arg6: memref<128x128xf32, #tpu.memory_space<vmem>>, %arg7: memref<128x128xf32, #tpu.memory_space<vmem>>, %arg8: memref<1x128xf32, #tpu.memory_space<vmem>>, %arg9: memref<1x128xf32, #tpu.memory_space<vmem>>, %arg10: memref<128x128xf32, #tpu.memory_space<vmem>>, %arg11: memref<128x128xf32, #tpu.memory_space<vmem>>, %arg12: memref<1x128xf32, #tpu.memory_space<vmem>>, %arg13: memref<1x128xf32, #tpu.memory_space<vmem>>, %arg14: memref<1x256x128xf32, #tpu.memory_space<vmem>>, %arg15: memref<1x1x128xf32, #tpu.memory_space<vmem>>, %arg16: memref<1x128x128xf32, #tpu.memory_space<vmem>>, %arg17: memref<1x1x128xf32, #tpu.memory_space<vmem>>, %arg18: memref<1x128x128xf32, #tpu.memory_space<vmem>>, %arg19: memref<1x1x128xf32, #tpu.memory_space<vmem>>, %arg20: memref<1x8x128xf32, #tpu.memory_space<vmem>>, %arg21: memref<1x8x128xf32, #tpu.memory_space<vmem>>, %arg22: memref<256x128xf32, #tpu.memory_space<vmem>>, %arg23: memref<1x128xf32, #tpu.memory_space<vmem>>, %arg24: memref<128x128xf32, #tpu.memory_space<vmem>>, %arg25: memref<1x128xf32, #tpu.memory_space<vmem>>, %arg26: memref<128x128xf32, #tpu.memory_space<vmem>>, %arg27: memref<1x128xf32, #tpu.memory_space<vmem>>) attributes {dimension_semantics = [#tpu.dimension_semantics<arbitrary>], iteration_bounds = array<i64: 4>, scalar_prefetch = 0 : i64, scratch_operands = 6 : i64, tpu.core_type = #tpu.core_type<tc>, window_params = [{pipeline_mode = #tpu.pipeline_mode<synchronous>, transform_indices = @transform_0, window_bounds = array<i64: 8, 256>}, {pipeline_mode = #tpu.pipeline_mode<synchronous>, transform_indices = @transform_1, window_bounds = array<i64: 256, 128>}, {pipeline_mode = #tpu.pipeline_mode<synchronous>, transform_indices = @transform_2, window_bounds = array<i64: 256, 128>}, {pipeline_mode = #tpu.pipeline_mode<synchronous>, transform_indices = @transform_3, window_bounds = array<i64: 1, 128>}, {pipeline_mode = #tpu.pipeline_mode<synchronous>, transform_indices = @transform_4, window_bounds = array<i64: 1, 128>}, {pipeline_mode = #tpu.pipeline_mode<synchronous>, transform_indices = @transform_5, window_bounds = array<i64: 128, 128>}, {pipeline_mode = #tpu.pipeline_mode<synchronous>, transform_indices = @transform_6, window_bounds = array<i64: 128, 128>}, {pipeline_mode = #tpu.pipeline_mode<synchronous>, transform_indices = @transform_7, window_bounds = array<i64: 1, 128>}, {pipeline_mode = #tpu.pipeline_mode<synchronous>, transform_indices = @transform_8, window_bounds = array<i64: 1, 128>}, {pipeline_mode = #tpu.pipeline_mode<synchronous>, transform_indices = @transform_9, window_bounds = array<i64: 128, 128>}, {pipeline_mode = #tpu.pipeline_mode<synchronous>, transform_indices = @transform_10, window_bounds = array<i64: 128, 128>}, {pipeline_mode = #tpu.pipeline_mode<synchronous>, transform_indices = @transform_11, window_bounds = array<i64: 1, 128>}, {pipeline_mode = #tpu.pipeline_mode<synchronous>, transform_indices = @transform_12, window_bounds = array<i64: 1, 128>}, {transform_indices = @transform_13, window_bounds = array<i64: 1, 256, 128>}, {transform_indices = @transform_14, window_bounds = array<i64: 1, 1, 128>}, {transform_indices = @transform_15, window_bounds = array<i64: 1, 128, 128>}, {transform_indices = @transform_16, window_bounds = array<i64: 1, 1, 128>}, {transform_indices = @transform_17, window_bounds = array<i64: 1, 128, 128>}, {transform_indices = @transform_18, window_bounds = array<i64: 1, 1, 128>}, {transform_indices = @transform_19, window_bounds = array<i64: 1, 8, 128>}, {transform_indices = @transform_20, window_bounds = array<i64: 1, 8, 128>}]} {
    %c0_i32 = arith.constant 0 : i32
    %0 = arith.cmpi eq, %arg0, %c0_i32 : i32
    %1 = arith.extui %0 : i1 to i32
    %c0_i32_0 = arith.constant 0 : i32
    %2 = arith.cmpi ne, %1, %c0_i32_0 : i32
    scf.if %2 {
      %c0_57 = arith.constant 0 : index
      %c0_58 = arith.constant 0 : index
      %74 = vector.load %arg3[%c0_57, %c0_58] : memref<256x128xf32, #tpu.memory_space<vmem>>, vector<256x128xf32>
      %75 = math.exp %74 : vector<256x128xf32>
      %cst_59 = arith.constant 1.000000e+00 : f32
      %76 = vector.broadcast %cst_59 : f32 to vector<256x128xf32>
      %77 = arith.addf %76, %75 : vector<256x128xf32>
      %78 = math.log %77 : vector<256x128xf32>
      %c0_60 = arith.constant 0 : index
      %c0_61 = arith.constant 0 : index
      %79 = vector.load %arg22[%c0_60, %c0_61] : memref<256x128xf32, #tpu.memory_space<vmem>>, vector<256x128xf32>
      tpu.vector_store %arg22[%c0_60, %c0_61], %78 {strides = array<i32>} : memref<256x128xf32, #tpu.memory_space<vmem>>, vector<256x128xf32>,
      %c0_62 = arith.constant 0 : index
      %c0_63 = arith.constant 0 : index
      %80 = vector.load %arg5[%c0_62, %c0_63] : memref<1x128xf32, #tpu.memory_space<vmem>>, vector<1x128xf32>
      %81 = math.exp %80 : vector<1x128xf32>
      %cst_64 = arith.constant 1.000000e+00 : f32
      %82 = vector.broadcast %cst_64 : f32 to vector<1x128xf32>
      %83 = arith.addf %82, %81 : vector<1x128xf32>
      %84 = math.log %83 : vector<1x128xf32>
      %c0_65 = arith.constant 0 : index
      %c0_66 = arith.constant 0 : index
      %85 = vector.load %arg23[%c0_65, %c0_66] : memref<1x128xf32, #tpu.memory_space<vmem>>, vector<1x128xf32>
      tpu.vector_store %arg23[%c0_65, %c0_66], %84 {strides = array<i32>} : memref<1x128xf32, #tpu.memory_space<vmem>>, vector<1x128xf32>,
      %c0_67 = arith.constant 0 : index
      %c0_68 = arith.constant 0 : index
      %86 = vector.load %arg7[%c0_67, %c0_68] : memref<128x128xf32, #tpu.memory_space<vmem>>, vector<128x128xf32>
      %87 = math.exp %86 : vector<128x128xf32>
      %cst_69 = arith.constant 1.000000e+00 : f32
      %88 = vector.broadcast %cst_69 : f32 to vector<128x128xf32>
      %89 = arith.addf %88, %87 : vector<128x128xf32>
      %90 = math.log %89 : vector<128x128xf32>
      %c0_70 = arith.constant 0 : index
      %c0_71 = arith.constant 0 : index
      %91 = vector.load %arg24[%c0_70, %c0_71] : memref<128x128xf32, #tpu.memory_space<vmem>>, vector<128x128xf32>
      tpu.vector_store %arg24[%c0_70, %c0_71], %90 {strides = array<i32>} : memref<128x128xf32, #tpu.memory_space<vmem>>, vector<128x128xf32>,
      %c0_72 = arith.constant 0 : index
      %c0_73 = arith.constant 0 : index
      %92 = vector.load %arg9[%c0_72, %c0_73] : memref<1x128xf32, #tpu.memory_space<vmem>>, vector<1x128xf32>
      %93 = math.exp %92 : vector<1x128xf32>
      %cst_74 = arith.constant 1.000000e+00 : f32
      %94 = vector.broadcast %cst_74 : f32 to vector<1x128xf32>
      %95 = arith.addf %94, %93 : vector<1x128xf32>
      %96 = math.log %95 : vector<1x128xf32>
      %c0_75 = arith.constant 0 : index
      %c0_76 = arith.constant 0 : index
      %97 = vector.load %arg25[%c0_75, %c0_76] : memref<1x128xf32, #tpu.memory_space<vmem>>, vector<1x128xf32>
      tpu.vector_store %arg25[%c0_75, %c0_76], %96 {strides = array<i32>} : memref<1x128xf32, #tpu.memory_space<vmem>>, vector<1x128xf32>,
      %c0_77 = arith.constant 0 : index
      %c0_78 = arith.constant 0 : index
      %98 = vector.load %arg11[%c0_77, %c0_78] : memref<128x128xf32, #tpu.memory_space<vmem>>, vector<128x128xf32>
      %99 = math.exp %98 : vector<128x128xf32>
      %cst_79 = arith.constant 1.000000e+00 : f32
      %100 = vector.broadcast %cst_79 : f32 to vector<128x128xf32>
      %101 = arith.addf %100, %99 : vector<128x128xf32>
      %102 = math.log %101 : vector<128x128xf32>
      %c0_80 = arith.constant 0 : index
      %c0_81 = arith.constant 0 : index
      %103 = vector.load %arg26[%c0_80, %c0_81] : memref<128x128xf32, #tpu.memory_space<vmem>>, vector<128x128xf32>
      tpu.vector_store %arg26[%c0_80, %c0_81], %102 {strides = array<i32>} : memref<128x128xf32, #tpu.memory_space<vmem>>, vector<128x128xf32>,
      %c0_82 = arith.constant 0 : index
      %c0_83 = arith.constant 0 : index
      %104 = vector.load %arg13[%c0_82, %c0_83] : memref<1x128xf32, #tpu.memory_space<vmem>>, vector<1x128xf32>
      %105 = math.exp %104 : vector<1x128xf32>
      %cst_84 = arith.constant 1.000000e+00 : f32
      %106 = vector.broadcast %cst_84 : f32 to vector<1x128xf32>
      %107 = arith.addf %106, %105 : vector<1x128xf32>
      %108 = math.log %107 : vector<1x128xf32>
      %c0_85 = arith.constant 0 : index
      %c0_86 = arith.constant 0 : index
      %109 = vector.load %arg27[%c0_85, %c0_86] : memref<1x128xf32, #tpu.memory_space<vmem>>, vector<1x128xf32>
      tpu.vector_store %arg27[%c0_85, %c0_86], %108 {strides = array<i32>} : memref<1x128xf32, #tpu.memory_space<vmem>>, vector<1x128xf32>,
    } else {
    }
    %c0 = arith.constant 0 : index
    %c0_1 = arith.constant 0 : index
    %3 = vector.load %arg1[%c0, %c0_1] : memref<8x256xf32, #tpu.memory_space<vmem>>, vector<8x256xf32>
    %c0_2 = arith.constant 0 : index
    %c0_3 = arith.constant 0 : index
    %4 = vector.load %arg2[%c0_2, %c0_3] : memref<256x128xf32, #tpu.memory_space<vmem>>, vector<256x128xf32>
    %c0_4 = arith.constant 0 : index
    %c0_5 = arith.constant 0 : index
    %5 = vector.load %arg22[%c0_4, %c0_5] : memref<256x128xf32, #tpu.memory_space<vmem>>, vector<256x128xf32>
    %c0_6 = arith.constant 0 : index
    %c0_7 = arith.constant 0 : index
    %c0_8 = arith.constant 0 : index
    %6 = vector.load %arg14[%c0_6, %c0_7, %c0_8] : memref<1x256x128xf32, #tpu.memory_space<vmem>>, vector<1x256x128xf32>
    %7 = vector.shape_cast %6 : vector<1x256x128xf32> to vector<256x128xf32>
    %8 = arith.mulf %5, %7 : vector<256x128xf32>
    %9 = arith.addf %4, %8 : vector<256x128xf32>
    %c0_9 = arith.constant 0 : index
    %c0_10 = arith.constant 0 : index
    %10 = vector.load %arg4[%c0_9, %c0_10] : memref<1x128xf32, #tpu.memory_space<vmem>>, vector<1x128xf32>
    %c0_11 = arith.constant 0 : index
    %c0_12 = arith.constant 0 : index
    %11 = vector.load %arg23[%c0_11, %c0_12] : memref<1x128xf32, #tpu.memory_space<vmem>>, vector<1x128xf32>
    %c0_13 = arith.constant 0 : index
    %c0_14 = arith.constant 0 : index
    %c0_15 = arith.constant 0 : index
    %12 = vector.load %arg15[%c0_13, %c0_14, %c0_15] : memref<1x1x128xf32, #tpu.memory_space<vmem>>, vector<1x1x128xf32>
    %13 = vector.shape_cast %12 : vector<1x1x128xf32> to vector<1x128xf32>
    %14 = arith.mulf %11, %13 : vector<1x128xf32>
    %15 = arith.addf %10, %14 : vector<1x128xf32>
    %c0_16 = arith.constant 0 : index
    %c0_17 = arith.constant 0 : index
    %16 = vector.load %arg6[%c0_16, %c0_17] : memref<128x128xf32, #tpu.memory_space<vmem>>, vector<128x128xf32>
    %c0_18 = arith.constant 0 : index
    %c0_19 = arith.constant 0 : index
    %17 = vector.load %arg24[%c0_18, %c0_19] : memref<128x128xf32, #tpu.memory_space<vmem>>, vector<128x128xf32>
    %c0_20 = arith.constant 0 : index
    %c0_21 = arith.constant 0 : index
    %c0_22 = arith.constant 0 : index
    %18 = vector.load %arg16[%c0_20, %c0_21, %c0_22] : memref<1x128x128xf32, #tpu.memory_space<vmem>>, vector<1x128x128xf32>
    %19 = vector.shape_cast %18 : vector<1x128x128xf32> to vector<128x128xf32>
    %20 = arith.mulf %17, %19 : vector<128x128xf32>
    %21 = arith.addf %16, %20 : vector<128x128xf32>
    %c0_23 = arith.constant 0 : index
    %c0_24 = arith.constant 0 : index
    %22 = vector.load %arg8[%c0_23, %c0_24] : memref<1x128xf32, #tpu.memory_space<vmem>>, vector<1x128xf32>
    %c0_25 = arith.constant 0 : index
    %c0_26 = arith.constant 0 : index
    %23 = vector.load %arg25[%c0_25, %c0_26] : memref<1x128xf32, #tpu.memory_space<vmem>>, vector<1x128xf32>
    %c0_27 = arith.constant 0 : index
    %c0_28 = arith.constant 0 : index
    %c0_29 = arith.constant 0 : index
    %24 = vector.load %arg17[%c0_27, %c0_28, %c0_29] : memref<1x1x128xf32, #tpu.memory_space<vmem>>, vector<1x1x128xf32>
    %25 = vector.shape_cast %24 : vector<1x1x128xf32> to vector<1x128xf32>
    %26 = arith.mulf %23, %25 : vector<1x128xf32>
    %27 = arith.addf %22, %26 : vector<1x128xf32>
    %c0_30 = arith.constant 0 : index
    %c0_31 = arith.constant 0 : index
    %28 = vector.load %arg10[%c0_30, %c0_31] : memref<128x128xf32, #tpu.memory_space<vmem>>, vector<128x128xf32>
    %c0_32 = arith.constant 0 : index
    %c0_33 = arith.constant 0 : index
    %29 = vector.load %arg26[%c0_32, %c0_33] : memref<128x128xf32, #tpu.memory_space<vmem>>, vector<128x128xf32>
    %c0_34 = arith.constant 0 : index
    %c0_35 = arith.constant 0 : index
    %c0_36 = arith.constant 0 : index
    %30 = vector.load %arg18[%c0_34, %c0_35, %c0_36] : memref<1x128x128xf32, #tpu.memory_space<vmem>>, vector<1x128x128xf32>
    %31 = vector.shape_cast %30 : vector<1x128x128xf32> to vector<128x128xf32>
    %32 = arith.mulf %29, %31 : vector<128x128xf32>
    %33 = arith.addf %28, %32 : vector<128x128xf32>
    %c0_37 = arith.constant 0 : index
    %c0_38 = arith.constant 0 : index
    %34 = vector.load %arg12[%c0_37, %c0_38] : memref<1x128xf32, #tpu.memory_space<vmem>>, vector<1x128xf32>
    %c0_39 = arith.constant 0 : index
    %c0_40 = arith.constant 0 : index
    %35 = vector.load %arg27[%c0_39, %c0_40] : memref<1x128xf32, #tpu.memory_space<vmem>>, vector<1x128xf32>
    %c0_41 = arith.constant 0 : index
    %c0_42 = arith.constant 0 : index
    %c0_43 = arith.constant 0 : index
    %36 = vector.load %arg19[%c0_41, %c0_42, %c0_43] : memref<1x1x128xf32, #tpu.memory_space<vmem>>, vector<1x1x128xf32>
    %37 = vector.shape_cast %36 : vector<1x1x128xf32> to vector<1x128xf32>
    %38 = arith.mulf %35, %37 : vector<1x128xf32>
    %39 = arith.addf %34, %38 : vector<1x128xf32>
    %cst = arith.constant dense<0.000000e+00> : vector<8x128xf32>
    %40 = tpu.matmul %3, %9, %cst {dimension_numbers = #tpu.dot_dimension_numbers<[1], [0], [0], [1], [0, 0, 1, 1], [], []>} : vector<8x256xf32>, vector<256x128xf32>, vector<8x128xf32> -> vector<8x128xf32>
    %41 = vector.broadcast %15 : vector<1x128xf32> to vector<8x128xf32>
    %42 = arith.addf %40, %41 : vector<8x128xf32>
    %cst_44 = arith.constant 0.000000e+00 : f32
    %43 = vector.broadcast %cst_44 : f32 to vector<8x128xf32>
    %44 = arith.maximumf %42, %43 : vector<8x128xf32>
    %cst_45 = arith.constant dense<0.000000e+00> : vector<8x128xf32>
    %45 = tpu.matmul %44, %21, %cst_45 {dimension_numbers = #tpu.dot_dimension_numbers<[1], [0], [0], [1], [0, 0, 1, 1], [], []>} : vector<8x128xf32>, vector<128x128xf32>, vector<8x128xf32> -> vector<8x128xf32>
    %46 = vector.broadcast %27 : vector<1x128xf32> to vector<8x128xf32>
    %47 = arith.addf %45, %46 : vector<8x128xf32>
    %cst_46 = arith.constant 0.000000e+00 : f32
    %48 = vector.broadcast %cst_46 : f32 to vector<8x128xf32>
    %49 = arith.maximumf %47, %48 : vector<8x128xf32>
    %cst_47 = arith.constant dense<0.000000e+00> : vector<8x128xf32>
    %50 = tpu.matmul %49, %33, %cst_47 {dimension_numbers = #tpu.dot_dimension_numbers<[1], [0], [0], [1], [0, 0, 1, 1], [], []>} : vector<8x128xf32>, vector<128x128xf32>, vector<8x128xf32> -> vector<8x128xf32>
    %51 = vector.broadcast %39 : vector<1x128xf32> to vector<8x128xf32>
    %52 = arith.addf %50, %51 : vector<8x128xf32>
    %c0_48 = arith.constant 0 : index
    %c0_49 = arith.constant 0 : index
    %c0_50 = arith.constant 0 : index
    %53 = vector.load %arg21[%c0_48, %c0_49, %c0_50] : memref<1x8x128xf32, #tpu.memory_space<vmem>>, vector<1x8x128xf32>
    %54 = vector.shape_cast %53 : vector<1x8x128xf32> to vector<8x128xf32>
    %55 = vector.shape_cast %52 : vector<8x128xf32> to vector<1x8x128xf32>
    tpu.vector_store %arg21[%c0_48, %c0_49, %c0_50], %55 {strides = array<i32>} : memref<1x8x128xf32, #tpu.memory_space<vmem>>, vector<1x8x128xf32>,
    %56 = tpu.iota {dimensions = array<i32: 1>} : vector<8x128xi32>
    %c10_i32 = arith.constant 10 : i32
    %57 = vector.broadcast %c10_i32 : i32 to vector<8x128xi32>
    %58 = arith.cmpi slt, %56, %57 : vector<8x128xi32>
    %cst_51 = arith.constant -1.000000e+30 : f32
    %59 = vector.broadcast %cst_51 : f32 to vector<8x128xf32>
    %60 = arith.select %58, %52, %59 : vector<8x128xi1>, vector<8x128xf32>
    %cst_52 = arith.constant dense<0xFF800000> : vector<8xf32>
    %61 = vector.multi_reduction <maximumf>, %60, %cst_52 [1] : vector<8x128xf32> to vector<8xf32>
    %62 = vector.shape_cast %61 : vector<8xf32> to vector<8x1xf32>
    %63 = vector.broadcast %62 : vector<8x1xf32> to vector<8x128xf32>
    %64 = arith.subf %60, %63 : vector<8x128xf32>
    %65 = math.exp %64 : vector<8x128xf32>
    %cst_53 = arith.constant dense<0.000000e+00> : vector<8xf32>
    %66 = vector.multi_reduction <add>, %65, %cst_53 [1] : vector<8x128xf32> to vector<8xf32>
    %67 = vector.shape_cast %66 : vector<8xf32> to vector<8x1xf32>
    %68 = math.log %67 : vector<8x1xf32>
    %69 = vector.broadcast %68 : vector<8x1xf32> to vector<8x128xf32>
    %70 = arith.subf %64, %69 : vector<8x128xf32>
    %c0_54 = arith.constant 0 : index
    %c0_55 = arith.constant 0 : index
    %c0_56 = arith.constant 0 : index
    %71 = vector.load %arg20[%c0_54, %c0_55, %c0_56] : memref<1x8x128xf32, #tpu.memory_space<vmem>>, vector<1x8x128xf32>
    %72 = vector.shape_cast %71 : vector<1x8x128xf32> to vector<8x128xf32>
    %73 = vector.shape_cast %70 : vector<8x128xf32> to vector<1x8x128xf32>
    tpu.vector_store %arg20[%c0_54, %c0_55, %c0_56], %73 {strides = array<i32>} : memref<1x8x128xf32, #tpu.memory_space<vmem>>, vector<1x8x128xf32>,
    return
  }
  func.func @transform_0(%arg0: i32) -> (i32, i32) {
    %c0_i32 = arith.constant 0 : i32
    %c0_i32_0 = arith.constant 0 : i32
    %c0_i32_1 = arith.constant 0 : i32
    return %c0_i32, %c0_i32_0 : i32, i32
  }
  func.func @transform_1(%arg0: i32) -> (i32, i32) {
    %c0_i32 = arith.constant 0 : i32
    %c0_i32_0 = arith.constant 0 : i32
    %c0_i32_1 = arith.constant 0 : i32
    return %c0_i32, %c0_i32_0 : i32, i32
  }
  func.func @transform_2(%arg0: i32) -> (i32, i32) {
    %c0_i32 = arith.constant 0 : i32
    %c0_i32_0 = arith.constant 0 : i32
    %c0_i32_1 = arith.constant 0 : i32
    return %c0_i32, %c0_i32_0 : i32, i32
  }
  func.func @transform_3(%arg0: i32) -> (i32, i32) {
    %c0_i32 = arith.constant 0 : i32
    %c0_i32_0 = arith.constant 0 : i32
    %c0_i32_1 = arith.constant 0 : i32
    return %c0_i32, %c0_i32_0 : i32, i32
  }
  func.func @transform_4(%arg0: i32) -> (i32, i32) {
    %c0_i32 = arith.constant 0 : i32
    %c0_i32_0 = arith.constant 0 : i32
    %c0_i32_1 = arith.constant 0 : i32
    return %c0_i32, %c0_i32_0 : i32, i32
  }
  func.func @transform_5(%arg0: i32) -> (i32, i32) {
    %c0_i32 = arith.constant 0 : i32
    %c0_i32_0 = arith.constant 0 : i32
    %c0_i32_1 = arith.constant 0 : i32
    return %c0_i32, %c0_i32_0 : i32, i32
  }
  func.func @transform_6(%arg0: i32) -> (i32, i32) {
    %c0_i32 = arith.constant 0 : i32
    %c0_i32_0 = arith.constant 0 : i32
    %c0_i32_1 = arith.constant 0 : i32
    return %c0_i32, %c0_i32_0 : i32, i32
  }
  func.func @transform_7(%arg0: i32) -> (i32, i32) {
    %c0_i32 = arith.constant 0 : i32
    %c0_i32_0 = arith.constant 0 : i32
    %c0_i32_1 = arith.constant 0 : i32
    return %c0_i32, %c0_i32_0 : i32, i32
  }
  func.func @transform_8(%arg0: i32) -> (i32, i32) {
    %c0_i32 = arith.constant 0 : i32
    %c0_i32_0 = arith.constant 0 : i32
    %c0_i32_1 = arith.constant 0 : i32
    return %c0_i32, %c0_i32_0 : i32, i32
  }
  func.func @transform_9(%arg0: i32) -> (i32, i32) {
    %c0_i32 = arith.constant 0 : i32
    %c0_i32_0 = arith.constant 0 : i32
    %c0_i32_1 = arith.constant 0 : i32
    return %c0_i32, %c0_i32_0 : i32, i32
  }
  func.func @transform_10(%arg0: i32) -> (i32, i32) {
    %c0_i32 = arith.constant 0 : i32
    %c0_i32_0 = arith.constant 0 : i32
    %c0_i32_1 = arith.constant 0 : i32
    return %c0_i32, %c0_i32_0 : i32, i32
  }
  func.func @transform_11(%arg0: i32) -> (i32, i32) {
    %c0_i32 = arith.constant 0 : i32
    %c0_i32_0 = arith.constant 0 : i32
    %c0_i32_1 = arith.constant 0 : i32
    return %c0_i32, %c0_i32_0 : i32, i32
  }
  func.func @transform_12(%arg0: i32) -> (i32, i32) {
    %c0_i32 = arith.constant 0 : i32
    %c0_i32_0 = arith.constant 0 : i32
    %c0_i32_1 = arith.constant 0 : i32
    return %c0_i32, %c0_i32_0 : i32, i32
  }
  func.func @transform_13(%arg0: i32) -> (i32, i32, i32) {
    %c0_i32 = arith.constant 0 : i32
    %c0_i32_0 = arith.constant 0 : i32
    %c0_i32_1 = arith.constant 0 : i32
    return %arg0, %c0_i32, %c0_i32_0 : i32, i32, i32
  }
  func.func @transform_14(%arg0: i32) -> (i32, i32, i32) {
    %c0_i32 = arith.constant 0 : i32
    %c0_i32_0 = arith.constant 0 : i32
    %c0_i32_1 = arith.constant 0 : i32
    return %arg0, %c0_i32, %c0_i32_0 : i32, i32, i32
  }
  func.func @transform_15(%arg0: i32) -> (i32, i32, i32) {
    %c0_i32 = arith.constant 0 : i32
    %c0_i32_0 = arith.constant 0 : i32
    %c0_i32_1 = arith.constant 0 : i32
    return %arg0, %c0_i32, %c0_i32_0 : i32, i32, i32
  }
  func.func @transform_16(%arg0: i32) -> (i32, i32, i32) {
    %c0_i32 = arith.constant 0 : i32
    %c0_i32_0 = arith.constant 0 : i32
    %c0_i32_1 = arith.constant 0 : i32
    return %arg0, %c0_i32, %c0_i32_0 : i32, i32, i32
  }
  func.func @transform_17(%arg0: i32) -> (i32, i32, i32) {
    %c0_i32 = arith.constant 0 : i32
    %c0_i32_0 = arith.constant 0 : i32
    %c0_i32_1 = arith.constant 0 : i32
    return %arg0, %c0_i32, %c0_i32_0 : i32, i32, i32
  }
  func.func @transform_18(%arg0: i32) -> (i32, i32, i32) {
    %c0_i32 = arith.constant 0 : i32
    %c0_i32_0 = arith.constant 0 : i32
    %c0_i32_1 = arith.constant 0 : i32
    return %arg0, %c0_i32, %c0_i32_0 : i32, i32, i32
  }
  func.func @transform_19(%arg0: i32) -> (i32, i32, i32) {
    %c0_i32 = arith.constant 0 : i32
    %c0_i32_0 = arith.constant 0 : i32
    %c0_i32_1 = arith.constant 0 : i32
    return %arg0, %c0_i32, %c0_i32_0 : i32, i32, i32
  }
  func.func @transform_20(%arg0: i32) -> (i32, i32, i32) {
    %c0_i32 = arith.constant 0 : i32
    %c0_i32_0 = arith.constant 0 : i32
    %c0_i32_1 = arith.constant 0 : i32
    return %arg0, %c0_i32, %c0_i32_0 : i32, i32, i32
  }
}

</mosaic_0001>

<bundles_post_ra>
// kernel: tpu_custom_call.1
= control target key start
LH: loop header
LB: loop body
LE: loop exit
PB: predicated region body
PF: predicated region fallthrough
CT: control target
= control target key end

     0   :  { %s4002_s0 = inlined_call_operand.hbm [shape: f32[8,256], index: 0, kind: input, shape index: {}]   ;;  %s4003_s1 = inlined_call_operand.hbm [shape: f32[256,128], index: 1, kind: input, shape index: {}]   ;;  %s4004_s2 = inlined_call_operand.hbm [shape: f32[256,128], index: 2, kind: input, shape index: {}]   ;;  %s4005_s3 = inlined_call_operand.hbm [shape: f32[1,128], index: 3, kind: input, shape index: {}]   ;;  %s4006_s4 = inlined_call_operand.hbm [shape: f32[1,128], index: 4, kind: input, shape index: {}]   ;;  %s4007_s5 = inlined_call_operand.hbm [shape: f32[128,128], index: 5, kind: input, shape index: {}]   ;;  %s4008_s6 = inlined_call_operand.hbm [shape: f32[128,128], index: 6, kind: input, shape index: {}]   ;;  %s4009_s7 = inlined_call_operand.hbm [shape: f32[1,128], index: 7, kind: input, shape index: {}]   ;;  %s4010_s8 = inlined_call_operand.vmem [shape: f32[1,128], index: 8, kind: input, shape index: {}]   ;;  %s4011_s9 = inlined_call_operand.hbm [shape: f32[128,128], index: 9, kind: input, shape index: {}]   ;;  %s4012_s10 = inlined_call_operand.hbm [shape: f32[128,128], index: 10, kind: input, shape index: {}]   ;;  %s4013_s11 = inlined_call_operand.vmem [shape: f32[1,128], index: 11, kind: input, shape index: {}]   ;;  %s4014_s12 = inlined_call_operand.vmem [shape: f32[1,128], index: 12, kind: input, shape index: {}]   ;;  %s4015_s13 = inlined_call_operand.hbm [shape: f32[4,256,128], index: 13, kind: input, shape index: {}]   ;;  %s4016_s14 = inlined_call_operand.vmem [shape: f32[4,1,128], index: 14, kind: input, shape index: {}]   ;;  %s4017_s15 = inlined_call_operand.hbm [shape: f32[4,128,128], index: 15, kind: input, shape index: {}]   ;;  %s4018_s16 = inlined_call_operand.vmem [shape: f32[4,1,128], index: 16, kind: input, shape index: {}]   ;;  %s4019_s17 = inlined_call_operand.hbm [shape: f32[4,128,128], index: 17, kind: input, shape index: {}]   ;;  %s4020_s18 = inlined_call_operand.vmem [shape: f32[4,1,128], index: 18, kind: input, shape index: {}]   ;;  %s4021_s19 = inlined_call_operand.hbm [shape: f32[4,8,128], index: 19, kind: output, shape index: {0}]   ;;  %s4022_s20 = inlined_call_operand.hbm [shape: f32[4,8,128], index: 20, kind: output, shape index: {1}]  }
   0x1   :  { %4047 = sst [smem:[#allocation45_spill]] %s4002_s0 }
   0x2   :  { %4048 = sst [smem:[#allocation46_spill]] %s4003_s1 }
   0x3   :  { %4049 = sst [smem:[#allocation47_spill]] %s4004_s2 }
   0x4   :  { %4050 = sst [smem:[#allocation48_spill]] %s4005_s3 }
   0x5   :  { %4051 = sst [smem:[#allocation49_spill]] %s4006_s4 }
   0x6   :  { %4052 = sst [smem:[#allocation50_spill]] %s4007_s5 }
   0x7   :  { %4053 = sst [smem:[#allocation51_spill]] %s4009_s7 }
   0x8   :  { %4054 = sst [smem:[#allocation52_spill]] %s4010_s8 }
   0x9   :  { %4055 = sst [smem:[#allocation53_spill]] %s4013_s11 }
   0xa   :  { %4056 = sst [smem:[#allocation54_spill]] %s4014_s12 }
   0xb   :  { %4057 = sst [smem:[#allocation55_spill]] %s4015_s13 }
   0xc   :  { %4058 = sst [smem:[#allocation56_spill]] %s4018_s16 }
   0xd   :  { %4059 = sst [smem:[#allocation57_spill]] %s4020_s18 }
   0xe   :  { %4060 = sst [smem:[#allocation58_spill]] %s4021_s19 }
   0xf   :  { %4061 = sst [smem:[#allocation59_spill]] %s4022_s20 }
  0x10   :  { %26 = vsyncpa [#allocation9], 0 }
  0x11   :  { %27 = vsyncpa [#allocation12], 0 }
  0x12   :  { %28 = vsyncpa [#allocation15], 0 }
  0x13   :  { %29 = vsyncpa [#allocation18], 0 }
  0x14   :  { %30 = vsyncpa [#allocation21], 0 }
  0x15   :  { %31 = vsyncpa [#allocation24], 0 }
  0x16   :  { %32 = vsyncpa [#allocation10], 0 }
  0x17   :  { %34 = vsyncpa [#allocation10 + $0x1], 0 }
  0x18   :  { %35 = vsyncpa [#allocation30], 0 }
  0x19   :  { %37 = vsyncpa [#allocation30 + $0x1], 0  ;;  %s3475_s1 = smov 0   ;;  %s3477_s22 = smov 0  }
  0x1a   :  { %s3479_s23 = smov 0   ;;  %s3481_s24 = smov 0  }
  0x1b LB: > { %4062 = sst [smem:[#allocation40_spill]] %s3337_s1  ;;  %s3351_s2 = smov [#allocation8]   ;;  %s3349_s24 = sphi %s3481_s24, %s4121_s24   ;;  %s3345_s23 = sphi %s3479_s23, %s4125_s23   ;;  %s3341_s22 = sphi %s3477_s22, %s4124_s22   ;;  %s3337_s1 = sphi %s3475_s1, %s4123_s1  }
  0x1c   : > { %s542_s25 = sshll.u32 %s3351_s2, 4  ;;  %s3496_s3 = sadd.s32 4294967295, %s3349_s24   ;;  %s543_s25 = int_to_ptr.vmem [resolvable:$true] %s542_s25 }
  0x1d   : > { %p2263_p0 = scmp.ge.s32.totalorder %s3349_s24, 1  ;;  %p4032_p1 = scmp.eq.s32.totalorder %s3496_s3, 0 }
  0x1e   : > { %p529_p2 = scmp.lt.s32.totalorder %s3349_s24, 5  ;;  %s2262_s28 = sadd.s32 4294967294, %s3349_s24  }
  0x1f   : > { %s3516_s4 = sadd.s32 1, %s3349_s24   ;;  %s2898_s0 = scalar_lea.vmem %s543_s25, 256 }
  0x20   : > { %p3502_p4 = pnand %p2263_p0, %p529_p2  ;;  %4065 = sst [smem:[#allocation41_spill]] %s3516_s4 }
  0x21   : > { %s320_s29 = ssub.s32 %s3349_s24, %s3516_s4  ;;  %p2899_p8 = scmp.ne.s32.totalorder %s543_s25, %s2898_s0 }
  0x22   : > { %s4063_s26 = scalar_select %p3502_p4, 1, 0 }
  0x23   : > { %p2499_p5 = pneg %p3502_p4  ;;  %p2906_p11 = scmp.lt.s32.totalorder %s543_s25, %s543_s25 }
  0x24   : > { %p2907_p12 = scmp.lt.s32.totalorder %s2898_s0, %s2898_s0 }
  0x25   : > { %p3510_p6 = pnand %p2499_p5, %p4032_p1 }
  0x26   : > { %p2908_p13 = por %p2907_p12, %p2906_p11 }
  0x27   : > { %s4064_s27 = scalar_select %p3510_p6, 1, 0 }
  0x28   : > { %p3522_p7 = pneg %p3510_p6 }
  0x2a   : > { %s4066_s30 = scalar_select %p3522_p7, 1, 0 }
  0x2b   : > { %p2901_p9 = pnand %p2899_p8, %p3522_p7 }
  0x2d   : > { %p2902_p10 = pneg %p2901_p9 }
  0x2f   : > { %p2909_p0 = pnand %p2908_p13, %p2902_p10 }
  0x31   : > { %2912 = shalt.err (!%p2909_p0)
}
  0x32   : > { %s4067_s4 = sld [smem:[#allocation45_spill]]  ;;  %p321_p2 = scmp.eq.s32.totalorder %s320_s29, 0 }
  0x33   : > { %s323_s0 = sadd.s32 1, %s3345_s23  ;;  %p330_p5 = scmp.ne.s32.totalorder %s3345_s23, %s3341_s22 }
  0x34   : > { %p331_p8 = scmp.eq.s32.totalorder %s3349_s24, 0  ;;  %p336_p10 = scmp.ne.s32.totalorder %s3341_s22, %s3337_s1 }
  0x35   : > { %s3538_s21 = scalar_select %p321_p2, %s3345_s23, %s323_s0  }
  0x36   : > { %p3540_p9 = por %p331_p8, %p330_p5  ;;  %p490_p11 = scmp.eq.s32.totalorder %s3496_s3, 3 }
  0x37   : > { %4068 = sst [smem:[#allocation42_spill]] %s3538_s21  ;;  %p496_p12 = scmp.eq.s32.totalorder %s2262_s28, 3 }
  0x38   : > { %2502 = dma.hbm_to_vmem [thread:$0]  (!%p3510_p6), %s4067_s4, 256, %s543_s25, [#allocation9]  }
  0x39   : > { %p3549_p13 = por %p4032_p1, %p336_p10  ;;  %p3553_p0 = por %p490_p11, %p330_p5 }
  0x3a   : > { %p3557_p3 = por %p496_p12, %p336_p10  ;;  %p2557_p2 = scmp.lt.s32.totalorder %s3349_s24, 4 }
  0x3b   : > { %s4070_s19 = scalar_select %p3549_p13, 1, 0 }
  0x3c   : > { %s4071_s25 = scalar_select %p3553_p0, 1, 0 }
  0x3d   : > { %s4073_s4 = scalar_select %p3557_p3, 1, 0 }
  0x3e   : > { %4072 = sst [smem:[#allocation43_spill]] %s4071_s25  ;;  %s673_s29 = sand.u32 1, %s3349_s24  }
  0x3f   : > { %4074 = sst [smem:[#allocation44_spill]] %s4073_s4  ;;  %s4031_s0 = sand.u32 1, %s3345_s23  }
  0x40   : > { %s2275_s21 = sshll.u32 %s4031_s0, 8  ;;  %s2307_s1 = sshll.u32 %s3349_s24, 12 }
  0x41   : > { %s4075_s13 = sld [smem:[#allocation55_spill]]  ;;  %s677_s12 = scalar_lea.vmem [#allocation25], %s2275_s21 }
  0x42   : > { %s684_s25 = sshll.u32 %s677_s12, 4  ;;  %p3576_p5 = pnand %p2557_p2, %p3540_p9  ;;  %s3572_s25 = int_to_ptr.vmem [resolvable:$true] %s684_s25 }
  0x43   : > { %s3352_s0 = smov [#allocation11]   ;;  %s3582_s18 = scalar_lea.sflag [#allocation9], %s673_s29 }
  0x44   : > { %s3580_s8 = sshll.u32 %s3352_s0, 4  ;;  %p3588_p10 = pneg %p3576_p5  ;;  %s553_s8 = int_to_ptr.vmem [resolvable:$true] %s3580_s8 }
  0x47   : > { %s3570_s11 = scalar_lea.hbm %s4075_s13, %s2307_s1  ;;  %s2918_s2 = scalar_lea.hbm %s4075_s13, 16384 }
  0x48   : > { %s2913_s20 = scalar_lea.hbm %s3570_s11, 4096  ;;  %p2919_p12 = scmp.lt.s32.totalorder %s3570_s11, %s4075_s13 }
  0x49   : > { %p2914_p8 = scmp.ne.s32.totalorder %s3570_s11, %s2913_s20  ;;  %p2920_p2 = scmp.lt.s32.totalorder %s2918_s2, %s2913_s20 }
  0x4b   : > { %p2916_p11 = pnand %p3588_p10, %p2914_p8  ;;  %p2921_p1 = por %p2920_p2, %p2919_p12 }
  0x4d   : > { %p2917_p9 = pneg %p2916_p11 }
  0x4f   : > { %p2922_p3 = pnand %p2921_p1, %p2917_p9 }
  0x51   : > { %2925 = shalt.err (!%p2922_p3)
}
  0x52   : > { %s2926_s29 = scalar_lea.vmem %s3572_s25, 4096  ;;  %s3353_s16 = smov [#allocation25]  }
  0x53   : > { %p2927_p0 = scmp.ne.s32.totalorder %s3572_s25, %s2926_s29  ;;  %s2931_s12 = sshll.u32 %s3353_s16, 4  ;;  %s2932_s12 = int_to_ptr.vmem [resolvable:$false] %s2931_s12 }
  0x54   : > { %s2933_s21 = scalar_lea.vmem %s2932_s12, 8192  ;;  %p2934_p13 = scmp.lt.s32.totalorder %s3572_s25, %s2932_s12 }
  0x55   : > { %p2929_p8 = pnand %p2927_p0, %p3588_p10  ;;  %p2935_p4 = scmp.lt.s32.totalorder %s2933_s21, %s2926_s29 }
  0x57   : > { %p2930_p11 = pneg %p2929_p8  ;;  %p2936_p6 = por %p2935_p4, %p2934_p13 }
  0x59   : > { %p2937_p7 = pnand %p2936_p6, %p2930_p11 }
  0x5b   : > { %2940 = shalt.err (!%p2937_p7)
}
  0x5c   : > { %s4040_s20 = smov 128   ;;  %s4042_s2 = smov 8  }
  0x5d   : > { %2533 = dma.hbm_to_vmem [thread:$0]  (!%p3576_p5), %s3570_s11, 4096, %s3572_s25, %s3582_s18, %s4040_s20, %s4040_s20, %s4042_s2  }
  0x5e   : > { %s3356_s16 = smov [#allocation14]   ;;  %s2952_s0 = scalar_lea.vmem %s553_s8, 4096 }
  0x5f   : > { %s579_s28 = sshll.u32 %s3356_s16, 4  ;;  %p2953_p1 = scmp.ne.s32.totalorder %s553_s8, %s2952_s0  ;;  %s580_s28 = int_to_ptr.vmem [resolvable:$true] %s579_s28 }
  0x60   : > { %p4078_p3 = scmp.ne.s32.totalorder %s4066_s30, 0  ;;  %p2960_p7 = scmp.lt.s32.totalorder %s553_s8, %s553_s8 }
  0x61   : > { %p2961_p13 = scmp.lt.s32.totalorder %s2952_s0, %s2952_s0 }
  0x62   : > { %p2955_p4 = pnand %p2953_p1, %p4078_p3 }
  0x63   : > { %p2962_p0 = por %p2961_p13, %p2960_p7 }
  0x64   : > { %p2956_p6 = pneg %p2955_p4 }
  0x66   : > { %p2963_p9 = pnand %p2962_p0, %p2956_p6 }
  0x68   : > { %2966 = shalt.err (!%p2963_p9)
}
  0x69   : > { %p4079_p12 = scmp.ne.s32.totalorder %s4064_s27, 0  ;;  %s4080_s25 = sld [smem:[#allocation46_spill]] }
  0x6a   : > { %s2978_s12 = scalar_lea.vmem %s580_s28, 16  ;;  %s2985_s21 = scalar_lea.vmem %s580_s28, 32 }
  0x6b   : > { %p2979_p2 = scmp.ne.s32.totalorder %s580_s28, %s2978_s12  ;;  %p2986_p1 = scmp.lt.s32.totalorder %s580_s28, %s580_s28 }
  0x6c   : > { %p2987_p4 = scmp.lt.s32.totalorder %s2985_s21, %s2978_s12 }
  0x6d   : > { %p2981_p8 = pnand %p2979_p2, %p4078_p3 }
  0x6e   : > { %p2988_p6 = por %p2987_p4, %p2986_p1 }
  0x6f   : > { %2505 = dma.hbm_to_vmem [thread:$0]  (!%p4079_p12), %s4080_s25, 4096, %s553_s8, [#allocation12], %s4040_s20, %s4040_s20, %s4042_s2  }
  0x70   : > { %p2982_p11 = pneg %p2981_p8 }
  0x72   : > { %p2989_p7 = pnand %p2988_p6, %p2982_p11 }
  0x74   : > { %2992 = shalt.err (!%p2989_p7)
}
  0x75   : > { %s4081_s13 = sld [smem:[#allocation48_spill]]  ;;  %s3357_s8 = smov [#allocation17]  }
  0x76   : > { %s600_s29 = sshll.u32 %s3357_s8, 4  ;;  %s3358_s11 = smov [#allocation20]   ;;  %s601_s29 = int_to_ptr.vmem [resolvable:$true] %s600_s29 }
  0x77   : > { %s627_s25 = sshll.u32 %s3358_s11, 4  ;;  %s3004_s20 = scalar_lea.vmem %s601_s29, 2048  ;;  %s628_s25 = int_to_ptr.vmem [resolvable:$true] %s627_s25 }
  0x78   : > { %p3005_p13 = scmp.ne.s32.totalorder %s601_s29, %s3004_s20  ;;  %p3012_p2 = scmp.lt.s32.totalorder %s601_s29, %s601_s29 }
  0x79   : > { %p3013_p8 = scmp.lt.s32.totalorder %s3004_s20, %s3004_s20 }
  0x7a   : > { %p3007_p0 = pnand %p3005_p13, %p4078_p3 }
  0x7b   : > { %2511 = dma.hbm_to_vmem [thread:$0]  (!%p4079_p12), %s4081_s13, 16, %s580_s28, [#allocation15]  }
  0x7c   : > { %p3008_p9 = pneg %p3007_p0  ;;  %p3014_p11 = por %p3013_p8, %p3012_p2 }
  0x7e   : > { %p3015_p1 = pnand %p3014_p11, %p3008_p9 }
  0x80   : > { %3018 = shalt.err (!%p3015_p1)
}
  0x81   : > { %s4082_s12 = smov 128   ;;  %s4083_s5 = sld [smem:[#allocation50_spill]] }
  0x82   : > { %s4084_s21 = sand.u32 1, %s3345_s23   ;;  %s3030_s0 = scalar_lea.vmem %s628_s25, 16 }
  0x83   : > { %s3644_s16 = sshll.u32 %s4084_s21, 7  ;;  %p3031_p4 = scmp.ne.s32.totalorder %s628_s25, %s3030_s0 }
  0x84   : > { %s3037_s20 = scalar_lea.vmem %s628_s25, 32  ;;  %p3038_p13 = scmp.lt.s32.totalorder %s628_s25, %s628_s25 }
  0x85   : > { %p3033_p6 = pnand %p3031_p4, %p4078_p3  ;;  %p3039_p0 = scmp.lt.s32.totalorder %s3037_s20, %s3030_s0 }
  0x87   : > { %2517 = dma.hbm_to_vmem [thread:$0]  (!%p4079_p12), %s4083_s5, 2048, %s601_s29, [#allocation18], %s4082_s12, %s4082_s12, %s4042_s2  }
  0x88   : > { %p3034_p7 = pneg %p3033_p6  ;;  %p3040_p9 = por %p3039_p0, %p3038_p13 }
  0x8a   : > { %p3041_p2 = pnand %p3040_p9, %p3034_p7 }
  0x8c   : > { %3044 = shalt.err (!%p3041_p2)
}
  0x8d   : > { %s4085_s7 = sld [smem:[#allocation51_spill]]  ;;  %s4044_s29 = sshll.u32 %s3349_s24, 11 }
  0x8e   : > { %s3659_s21 = scalar_lea.hbm %s4017_s15, %s4044_s29  ;;  %s704_s0 = scalar_lea.vmem [#allocation26], %s3644_s16 }
  0x8f   : > { %s711_s20 = sshll.u32 %s704_s0, 4  ;;  %s3045_s2 = scalar_lea.hbm %s3659_s21, 2048  ;;  %s712_s20 = int_to_ptr.vmem [resolvable:$true] %s711_s20 }
  0x90   : > { %p3046_p8 = scmp.ne.s32.totalorder %s3659_s21, %s3045_s2  ;;  %s3050_s11 = scalar_lea.hbm %s4017_s15, 8192 }
  0x91   : > { %p3051_p4 = scmp.lt.s32.totalorder %s3659_s21, %s4017_s15  ;;  %p3052_p6 = scmp.lt.s32.totalorder %s3050_s11, %s3045_s2 }
  0x92   : > { %p3048_p11 = pnand %p3046_p8, %p3588_p10 }
  0x93   : > { %2523 = dma.hbm_to_vmem [thread:$0]  (!%p4079_p12), %s4085_s7, 16, %s628_s25, [#allocation21]  }
  0x94   : > { %p3049_p1 = pneg %p3048_p11  ;;  %p3053_p7 = por %p3052_p6, %p3051_p4 }
  0x96   : > { %p3054_p13 = pnand %p3053_p7, %p3049_p1 }
  0x98   : > { %3057 = shalt.err (!%p3054_p13)
}
  0x99   : > { %s3058_s13 = scalar_lea.vmem %s712_s20, 2048  ;;  %s3359_s28 = smov [#allocation26]  }
  0x9a   : > { %p3059_p0 = scmp.ne.s32.totalorder %s712_s20, %s3058_s13  ;;  %s3063_s0 = sshll.u32 %s3359_s28, 4  ;;  %s3064_s0 = int_to_ptr.vmem [resolvable:$false] %s3063_s0 }
  0x9b   : > { %s3065_s29 = scalar_lea.vmem %s3064_s0, 4096  ;;  %p3066_p8 = scmp.lt.s32.totalorder %s712_s20, %s3064_s0 }
  0x9c   : > { %p3061_p9 = pnand %p3059_p0, %p3588_p10  ;;  %p3067_p11 = scmp.lt.s32.totalorder %s3065_s29, %s3058_s13 }
  0x9e   : > { %p3062_p2 = pneg %p3061_p9  ;;  %p3068_p12 = por %p3067_p11, %p3066_p8 }
  0xa0   : > { %p3069_p3 = pnand %p3068_p12, %p3062_p2 }
  0xa2   : > { %3072 = shalt.err (!%p3069_p3)
}
  0xa3   : > { %s4086_s5 = smov 8   ;;  %s3360_s7 = smov [#allocation13]  }
  0xa4   : > { %2536 = dma.hbm_to_vmem [thread:$0]  (!%p3576_p5), %s3659_s21, 2048, %s712_s20, %s3582_s18, %s4082_s12, %s4082_s12, %s4086_s5  }
  0xa5   : > { %s565_s2 = sshll.u32 %s3360_s7, 4  ;;  %s3361_s8 = smov [#allocation16]   ;;  %s566_s2 = int_to_ptr.vmem [resolvable:$true] %s565_s2 }
  0xa6   : > { %s590_s25 = sshll.u32 %s3361_s8, 4  ;;  %s3084_s11 = scalar_lea.vmem %s566_s2, 4096  ;;  %s591_s25 = int_to_ptr.vmem [resolvable:$true] %s590_s25 }
  0xa7   : > { %p3085_p1 = scmp.ne.s32.totalorder %s566_s2, %s3084_s11  ;;  %p4087_p4 = scmp.ne.s32.totalorder %s4066_s30, 0 }
  0xa8   : > { %p3092_p3 = scmp.lt.s32.totalorder %s566_s2, %s566_s2  ;;  %p3093_p7 = scmp.lt.s32.totalorder %s3084_s11, %s3084_s11 }
  0xa9   : > { %p3087_p6 = pnand %p3085_p1, %p4087_p4 }
  0xaa   : > { %p3094_p13 = por %p3093_p7, %p3092_p3 }
  0xab   : > { %p3088_p12 = pneg %p3087_p6 }
  0xad   : > { %p3095_p0 = pnand %p3094_p13, %p3088_p12 }
  0xaf   : > { %3098 = shalt.err (!%p3095_p0)
}
  0xb0   : > { %p4088_p9 = scmp.ne.s32.totalorder %s4064_s27, 0  ;;  %s4089_s20 = sld [smem:[#allocation47_spill]] }
  0xb1   : > { %s3110_s13 = scalar_lea.vmem %s591_s25, 16  ;;  %s3117_s28 = scalar_lea.vmem %s591_s25, 32 }
  0xb2   : > { %p3111_p2 = scmp.ne.s32.totalorder %s591_s25, %s3110_s13  ;;  %p3118_p1 = scmp.lt.s32.totalorder %s591_s25, %s591_s25 }
  0xb3   : > { %p3119_p6 = scmp.lt.s32.totalorder %s3117_s28, %s3110_s13 }
  0xb4   : > { %p3113_p8 = pnand %p3111_p2, %p4087_p4 }
  0xb5   : > { %p3120_p12 = por %p3119_p6, %p3118_p1 }
  0xb6   : > { %2508 = dma.hbm_to_vmem [thread:$0]  (!%p4088_p9), %s4089_s20, 4096, %s566_s2, [#allocation12], %s4082_s12, %s4082_s12, %s4086_s5  }
  0xb7   : > { %p3114_p11 = pneg %p3113_p8 }
  0xb9   : > { %p3121_p3 = pnand %p3120_p12, %p3114_p11 }
  0xbb   : > { %3124 = shalt.err (!%p3121_p3)
}
  0xbc   : > { %s4090_s8 = sld [smem:[#allocation49_spill]]  ;;  %s3362_s2 = smov [#allocation19]  }
  0xbd   : > { %s613_s11 = sshll.u32 %s3362_s2, 4  ;;  %s3363_s29 = smov [#allocation22]   ;;  %s614_s11 = int_to_ptr.vmem [resolvable:$true] %s613_s11 }
  0xbe   : > { %s640_s21 = sshll.u32 %s3363_s29, 4  ;;  %s3136_s20 = scalar_lea.vmem %s614_s11, 2048  ;;  %s641_s21 = int_to_ptr.vmem [resolvable:$true] %s640_s21 }
  0xbf   : > { %p3137_p7 = scmp.ne.s32.totalorder %s614_s11, %s3136_s20  ;;  %p3144_p2 = scmp.lt.s32.totalorder %s614_s11, %s614_s11 }
  0xc0   : > { %p3145_p8 = scmp.lt.s32.totalorder %s3136_s20, %s3136_s20 }
  0xc1   : > { %p3139_p13 = pnand %p3137_p7, %p4087_p4 }
  0xc2   : > { %2514 = dma.hbm_to_vmem [thread:$0]  (!%p4088_p9), %s4090_s8, 16, %s591_s25, [#allocation15]  }
  0xc3   : > { %p3140_p0 = pneg %p3139_p13  ;;  %p3146_p11 = por %p3145_p8, %p3144_p2 }
  0xc5   : > { %p3147_p1 = pnand %p3146_p11, %p3140_p0 }
  0xc7   : > { %3150 = shalt.err (!%p3147_p1)
}
  0xc8   : > { %2520 = dma.hbm_to_vmem [thread:$0]  (!%p4088_p9), %s4008_s6, 2048, %s614_s11, [#allocation18], %s4082_s12, %s4082_s12, %s4086_s5  }
  0xc9   : > { %s3162_s28 = scalar_lea.vmem %s641_s21, 2048  ;;  %p3170_p7 = scmp.lt.s32.totalorder %s641_s21, %s641_s21 }
  0xca   : > { %p3163_p6 = scmp.ne.s32.totalorder %s641_s21, %s3162_s28  ;;  %p3171_p13 = scmp.lt.s32.totalorder %s3162_s28, %s3162_s28 }
  0xcc   : > { %p3165_p12 = pnand %p3163_p6, %p4087_p4  ;;  %p3172_p0 = por %p3171_p13, %p3170_p7 }
  0xce   : > { %p3166_p3 = pneg %p3165_p12 }
  0xd0   : > { %p3173_p2 = pnand %p3172_p0, %p3166_p3 }
  0xd2   : > { %3176 = shalt.err (!%p3173_p2)
}
  0xd3   : > { %2526 = dma.hbm_to_vmem [thread:$0]  (!%p4088_p9), %s4011_s9, 2048, %s641_s21, [#allocation21], %s4082_s12, %s4082_s12, %s4086_s5  }
  0xd4   : > { %s3364_s8 = smov [#allocation23]   ;;  %s4091_s11 = sshll.u32 %s3349_s24, 11 }
  0xd5   : > { %s653_s2 = sshll.u32 %s3364_s8, 4  ;;  %s3724_s25 = scalar_lea.hbm %s4019_s17, %s4091_s11  ;;  %s654_s2 = int_to_ptr.vmem [resolvable:$true] %s653_s2 }
  0xd6   : > { %s3188_s13 = scalar_lea.vmem %s654_s2, 2048  ;;  %p3196_p6 = scmp.lt.s32.totalorder %s654_s2, %s654_s2 }
  0xd7   : > { %p3189_p8 = scmp.ne.s32.totalorder %s654_s2, %s3188_s13  ;;  %p3197_p12 = scmp.lt.s32.totalorder %s3188_s13, %s3188_s13 }
  0xd9   : > { %p3191_p11 = pnand %p3189_p8, %p4087_p4  ;;  %p3198_p3 = por %p3197_p12, %p3196_p6 }
  0xdb   : > { %p3192_p1 = pneg %p3191_p11 }
  0xdd   : > { %p3199_p7 = pnand %p3198_p3, %p3192_p1 }
  0xdf   : > { %3202 = shalt.err (!%p3199_p7)
}
  0xe0   : > { %2529 = dma.hbm_to_vmem [thread:$0]  (!%p4088_p9), %s4012_s10, 2048, %s654_s2, [#allocation24], %s4082_s12, %s4082_s12, %s4086_s5  }
  0xe1   : > { %s731_s30 = scalar_lea.vmem [#allocation27], %s3644_s16  ;;  %s3203_s7 = scalar_lea.hbm %s3724_s25, 2048 }
  0xe2   : > { %s738_s0 = sshll.u32 %s731_s30, 4  ;;  %p3204_p4 = scmp.ne.s32.totalorder %s3724_s25, %s3203_s7  ;;  %s739_s0 = int_to_ptr.vmem [resolvable:$true] %s738_s0 }
  0xe3   : > { %s3208_s11 = scalar_lea.hbm %s4019_s17, 8192  ;;  %p3209_p2 = scmp.lt.s32.totalorder %s3724_s25, %s4019_s17 }
  0xe4   : > { %p3206_p13 = pnand %p3204_p4, %p3588_p10  ;;  %p3210_p8 = scmp.lt.s32.totalorder %s3208_s11, %s3203_s7 }
  0xe6   : > { %p3207_p0 = pneg %p3206_p13  ;;  %p3211_p11 = por %p3210_p8, %p3209_p2 }
  0xe8   : > { %p3212_p1 = pnand %p3211_p11, %p3207_p0 }
  0xea   : > { %3215 = shalt.err (!%p3212_p1)
}
  0xeb   : > { %s3216_s16 = scalar_lea.vmem %s739_s0, 2048  ;;  %s3365_s2 = smov [#allocation27]  }
  0xec   : > { %p3217_p9 = scmp.ne.s32.totalorder %s739_s0, %s3216_s16  ;;  %s3221_s13 = sshll.u32 %s3365_s2, 4  ;;  %s3222_s13 = int_to_ptr.vmem [resolvable:$false] %s3221_s13 }
  0xed   : > { %s3223_s21 = scalar_lea.vmem %s3222_s13, 4096  ;;  %p3224_p3 = scmp.lt.s32.totalorder %s739_s0, %s3222_s13 }
  0xee   : > { %p3219_p6 = pnand %p3217_p9, %p3588_p10  ;;  %p3225_p7 = scmp.lt.s32.totalorder %s3223_s21, %s3216_s16 }
  0xf0   : > { %p3220_p12 = pneg %p3219_p6  ;;  %p3226_p4 = por %p3225_p7, %p3224_p3 }
  0xf2   : > { %p3227_p13 = pnand %p3226_p4, %p3220_p12 }
  0xf4   : > { %3230 = shalt.err (!%p3227_p13)
}
  0xf5   : > { %2539 = dma.hbm_to_vmem [thread:$0]  (!%p3576_p5), %s3724_s25, 2048, %s739_s0, %s3582_s18, %s4082_s12, %s4082_s12, %s4086_s5  }
  0xf6   : > { %p4092_p10 = scmp.ne.s32.totalorder %s4063_s26, 0 }
  0xf7   : > { %p4093_p0 = scmp.eq.s32.totalorder (!%p4092_p10), %s3496_s3, 0 }
  0xf8   : > { %756 = sbr.rel (%p4092_p10) target bundleno = 1412 (0x584), region = 96 }
  0xfd   : > { %3300 = dma.done.wait (%p4093_p0), [#allocation9], 256   ;;  %p4094_p2 = pmov %p4093_p0 }
  0xfe   : > { %p4095_p8 = pmov %p4093_p0 }
  0xff   : > { %3302 = vsyncadd (%p4094_p2), [#allocation9], 4294967040 }
 0x100   : > { %3304 = dma.done.wait (%p4095_p8), [#allocation12], 8192   ;;  %p4096_p11 = pmov %p4093_p0 }
 0x101   : > { %p4097_p1 = pmov %p4093_p0 }
 0x102   : > { %3306 = vsyncadd (%p4096_p11), [#allocation12], 4294959104 }
 0x103   : > { %3308 = dma.done.wait (%p4097_p1), [#allocation15], 32   ;;  %p4098_p5 = pmov %p4093_p0 }
 0x104   : > { %p4099_p9 = pmov %p4093_p0 }
 0x105   : > { %3310 = vsyncadd (%p4098_p5), [#allocation15], 4294967264 }
 0x106   : > { %3312 = dma.done.wait (%p4099_p9), [#allocation18], 4096   ;;  %p4100_p6 = pmov %p4093_p0 }
 0x107   : > { %p4101_p12 = pmov %p4093_p0 }
 0x108   : > { %3314 = vsyncadd (%p4100_p6), [#allocation18], 4294963200 }
 0x109   : > { %3316 = dma.done.wait (%p4101_p12), [#allocation21], 2064   ;;  %p4102_p3 = pmov %p4093_p0 }
 0x10a   : > { %p4103_p7 = pmov %p4093_p0 }
 0x10b   : > { %3318 = vsyncadd (%p4102_p3), [#allocation21], 4294965232 }
 0x10c   : > { %3320 = dma.done.wait (%p4103_p7), [#allocation24], 2048   ;;  %p4104_p4 = pmov %p4093_p0 }
 0x10d   : > { %s798_s18 = sand.u32 1, %s3496_s3   ;;  %s3785_s26 = sand.u32 1, %s3341_s22  }
 0x10e   : > { %3322 = vsyncadd (%p4104_p4), [#allocation24], 4294965248  ;;  %s2295_s4 = sshll.u32 %s3785_s26, 8  ;;  %s799_s1 = scalar_lea.sflag [#allocation9], %s798_s18 }
 0x10f   : > { %s3788_s12 = scalar_lea.vmem [#allocation25], %s2295_s4  ;;  %p4105_p13 = scmp.ne.s32.totalorder %s4070_s19, 0 }
 0x111   : > { %3324 = dma.done.wait (%p4105_p13), %s799_s1, 8192  }
 0x112   : > { %3326 = vsyncadd (%p4105_p13), %s799_s1, 4294959104  ;;  %s2296_s5 = sshll.u32 %s3785_s26, 7  ;;  %s2298_s25 = sshll.u32 %s3785_s26, 3 }
 0x113   : > { %p901_p10 = scmp.lt.s32.totalorder %s3496_s3, 3  ;;  %s4106_s19 = sld [smem:[#allocation56_spill]] }
 0x114   : > { %s4107_s16 = sld [smem:[#allocation57_spill]]  ;;  %s3812_s13 = scalar_lea.vmem [#allocation26], %s2296_s5 }
 0x115   : > { %s3798_s28 = scalar_select %p901_p10, %s3496_s3, 3 }
 0x116   : > { %s3814_s21 = scalar_lea.vmem [#allocation27], %s2296_s5  ;;  %s3816_s18 = scalar_lea.vmem [#allocation28], %s2298_s25 }
 0x117   : > { %s903_s7 = scalar_lea.vmem %s4016_s14, %s3798_s28  ;;  %s3818_s4 = scalar_lea.vmem [#allocation29], %s2298_s25 }
 0x118   : > { %p4108_p0 = scmp.ne.s32.totalorder %s3496_s3, 0 }
 0x119   : > { %s906_s11 = scalar_lea.vmem %s4106_s19, %s3798_s28  ;;  %s4109_s25 = sld [smem:[#allocation52_spill]] (!%p4108_p0) }
 0x11a   : > { %s909_s2 = scalar_lea.vmem %s4107_s16, %s3798_s28  ;;  %913 = sbr.rel (%p4108_p0) target bundleno = 453 (0x1c5), region = 152 }
 0x11b   : > { %s4110_s27 = sld [smem:[#allocation54_spill]] (!%p4108_p0) }
 0x11f   : > { %v914_v0 = vld [vmem:[#allocation13] sm:$0xff]  ;;  %v915_v1 = vld [vmem:[#allocation13 + $0x8] sm:$0xff]  ;;  %v916_v2 = vld [vmem:[#allocation13 + $0x10] sm:$0xff] }
 0x120   : > { %v946_v3 = vmul.f32 1.442695, %v914_v0  ;;  %v948_v4 = vmul.f32 1.442695, %v915_v1  ;;  %v950_v5 = vmul.f32 1.442695, %v916_v2 }
 0x121   : > { %v917_v6 = vld [vmem:[#allocation13 + $0x18] sm:$0xff]  ;;  %v918_v7 = vld [vmem:[#allocation13 + $0x20] sm:$0xff]  ;;  %v919_v8 = vld [vmem:[#allocation13 + $0x28] sm:$0xff] }
 0x122   : > { %2615 = vpow2.f32 %v946_v3  ;;  %v952_v9 = vmul.f32 1.442695, %v917_v6  ;;  %v954_v10 = vmul.f32 1.442695, %v918_v7  ;;  %v956_v11 = vmul.f32 1.442695, %v919_v8 }
 0x123   : > { %2617 = vpow2.f32 %v948_v4  ;;  %v920_v12 = vld [vmem:[#allocation13 + $0x30] sm:$0xff]  ;;  %v921_v13 = vld [vmem:[#allocation13 + $0x38] sm:$0xff]  ;;  %v922_v14 = vld [vmem:[#allocation13 + $0x40] sm:$0xff] }
 0x124   : > { %2619 = vpow2.f32 %v950_v5  ;;  %v958_v15 = vmul.f32 1.442695, %v920_v12  ;;  %v960_v16 = vmul.f32 1.442695, %v921_v13  ;;  %v923_v17 = vld [vmem:[#allocation13 + $0x48] sm:$0xff]  ;;  %v924_v18 = vld [vmem:[#allocation13 + $0x50] sm:$0xff] }
 0x125   : > { %2621 = vpow2.f32 %v952_v9  ;;  %v962_v19 = vmul.f32 1.442695, %v922_v14  ;;  %v925_v20 = vld [vmem:[#allocation13 + $0x58] sm:$0xff]  ;;  %v964_v21 = vmul.f32 1.442695, %v923_v17  ;;  %v926_v22 = vld [vmem:[#allocation13 + $0x60] sm:$0xff] }
 0x126   : > { %2623 = vpow2.f32 %v954_v10  ;;  %v966_v23 = vmul.f32 1.442695, %v924_v18  ;;  %v927_v24 = vld [vmem:[#allocation13 + $0x68] sm:$0xff]  ;;  %v968_v25 = vmul.f32 1.442695, %v925_v20  ;;  %v928_v26 = vld [vmem:[#allocation13 + $0x70] sm:$0xff] }
 0x127   : > { %2625 = vpow2.f32 %v956_v11  ;;  %v970_v27 = vmul.f32 1.442695, %v926_v22  ;;  %v929_v28 = vld [vmem:[#allocation13 + $0x78] sm:$0xff]  ;;  %v972_v29 = vmul.f32 1.442695, %v927_v24  ;;  %v930_v57 = vld [vmem:[#allocation13 + $0x80] sm:$0xff] }
 0x128   : > { %2627 = vpow2.f32 %v958_v15  ;;  %v974_v30 = vmul.f32 1.442695, %v928_v26  ;;  %v976_v31 = vmul.f32 1.442695, %v929_v28  ;;  %v931_v60 = vld [vmem:[#allocation13 + $0x88] sm:$0xff]  ;;  %v932_v63 = vld [vmem:[#allocation13 + $0x90] sm:$0xff] }
 0x129   : > { %2629 = vpow2.f32 %v960_v16  ;;  %v978_v2 = vmul.f32 1.442695, %v930_v57  ;;  %v933_v3 = vld [vmem:[#allocation13 + $0x98] sm:$0xff]  ;;  %v980_v6 = vmul.f32 1.442695, %v931_v60  ;;  %v934_v7 = vld [vmem:[#allocation13 + $0xa0] sm:$0xff] }
 0x12a   : > { %2631 = vpow2.f32 %v962_v19  ;;  %v982_v10 = vmul.f32 1.442695, %v932_v63  ;;  %v935_v11 = vld [vmem:[#allocation13 + $0xa8] sm:$0xff]  ;;  %v984_v14 = vmul.f32 1.442695, %v933_v3  ;;  %v936_v15 = vld [vmem:[#allocation13 + $0xb0] sm:$0xff] }
 0x12b   : > { %2633 = vpow2.f32 %v964_v21  ;;  %v986_v18 = vmul.f32 1.442695, %v934_v7  ;;  %v937_v19 = vld [vmem:[#allocation13 + $0xb8] sm:$0xff]  ;;  %v988_v22 = vmul.f32 1.442695, %v935_v11 }
 0x12c   : > { %2635 = vpow2.f32 %v966_v23  ;;  %v938_v23 = vld [vmem:[#allocation13 + $0xc0] sm:$0xff]  ;;  %v990_v26 = vmul.f32 1.442695, %v936_v15 }
 0x12d   : > { %2637 = vpow2.f32 %v968_v25 }
 0x12e   : > { %2639 = vpow2.f32 %v970_v27  ;;  %v939_v27 = vld [vmem:[#allocation13 + $0xc8] sm:$0xff] }
 0x12f   : > { %v2616_v32 = vpop.eup %2615  ;;  %2641 = vpow2.f32 %v972_v29 }
 0x130   : > { %v2618_v33 = vpop.eup %2617  ;;  %v1010_v34 = vadd.f32 1.0, %v2616_v32  ;;  %2643 = vpow2.f32 %v974_v30  ;;  %v992_v30 = vmul.f32 1.442695, %v937_v19 }
 0x131   : > { %v2620_v35 = vpop.eup %2619  ;;  %v1011_v36 = vadd.f32 1.0, %v2618_v33  ;;  %2645 = vpow2.f32 %v976_v31  ;;  %v940_v31 = vld [vmem:[#allocation13 + $0xd0] sm:$0xff] }
 0x132   : > { %v2622_v37 = vpop.eup %2621  ;;  %2647 = vlog2.f32 %v1010_v34  ;;  %v1012_v38 = vadd.f32 1.0, %v2620_v35  ;;  %v994_v34 = vmul.f32 1.442695, %v938_v23  ;;  %v941_v35 = vld [vmem:[#allocation13 + $0xd8] sm:$0xff] }
 0x133   : > { %v2624_v39 = vpop.eup %2623  ;;  %2649 = vlog2.f32 %v1011_v36  ;;  %v1013_v40 = vadd.f32 1.0, %v2622_v37 }
 0x134   : > { %v2626_v41 = vpop.eup %2625  ;;  %2651 = vlog2.f32 %v1012_v38  ;;  %v1014_v42 = vadd.f32 1.0, %v2624_v39  ;;  %v996_v38 = vmul.f32 1.442695, %v939_v27  ;;  %v942_v39 = vld [vmem:[#allocation13 + $0xe0] sm:$0xff] }
 0x135   : > { %v2628_v43 = vpop.eup %2627  ;;  %2653 = vlog2.f32 %v1013_v40  ;;  %v1015_v44 = vadd.f32 1.0, %v2626_v41 }
 0x136   : > { %v2630_v45 = vpop.eup %2629  ;;  %2655 = vlog2.f32 %v1014_v42  ;;  %v1016_v46 = vadd.f32 1.0, %v2628_v43  ;;  %v998_v42 = vmul.f32 1.442695, %v940_v31  ;;  %v943_v43 = vld [vmem:[#allocation13 + $0xe8] sm:$0xff] }
 0x137   : > { %v2632_v47 = vpop.eup %2631  ;;  %2657 = vlog2.f32 %v1015_v44  ;;  %v1017_v48 = vadd.f32 1.0, %v2630_v45  ;;  %v1146_v31 = vld [vmem:[#allocation19 + $0x8] sm:$0xff] }
 0x138   : > { %v2634_v49 = vpop.eup %2633  ;;  %2659 = vlog2.f32 %v1016_v46  ;;  %v1018_v50 = vadd.f32 1.0, %v2632_v47  ;;  %v1000_v46 = vmul.f32 1.442695, %v941_v35  ;;  %v944_v47 = vld [vmem:[#allocation13 + $0xf0] sm:$0xff] }
 0x139   : > { %v2636_v51 = vpop.eup %2635  ;;  %2661 = vlog2.f32 %v1017_v48  ;;  %v1019_v52 = vadd.f32 1.0, %v2634_v49  ;;  %v1006_v57 = vmul.f32 1.442695, %v944_v47  ;;  %v1147_v35 = vld [vmem:[#allocation19 + $0x10] sm:$0xff]  ;;  %v1150_v47 = vld [vmem:[#allocation19 + $0x28] sm:$0xff] }
 0x13a   : > { %v2638_v53 = vpop.eup %2637  ;;  %2663 = vlog2.f32 %v1018_v50  ;;  %v1020_v54 = vadd.f32 1.0, %v2636_v51  ;;  %v1002_v50 = vmul.f32 1.442695, %v942_v39  ;;  %v945_v51 = vld [vmem:[#allocation13 + $0xf8] sm:$0xff] }
 0x13b   : > { %v2640_v55 = vpop.eup %2639  ;;  %2665 = vlog2.f32 %v1019_v52  ;;  %v1021_v56 = vadd.f32 1.0, %v2638_v53  ;;  %v1008_v60 = vmul.f32 1.442695, %v945_v51  ;;  %v1148_v39 = vld [vmem:[#allocation19 + $0x18] sm:$0xff]  ;;  %v1151_v51 = vld [vmem:[#allocation19 + $0x30] sm:$0xff] }
 0x13c   : > { %v2642_v58 = vpop.eup %2641  ;;  %2667 = vlog2.f32 %v1020_v54  ;;  %v1022_v59 = vadd.f32 1.0, %v2640_v55  ;;  %v1004_v54 = vmul.f32 1.442695, %v943_v43  ;;  %v1149_v43 = vld [vmem:[#allocation19 + $0x20] sm:$0xff] }
 0x13d   : > { %v2644_v61 = vpop.eup %2643  ;;  %2669 = vlog2.f32 %v1021_v56  ;;  %v1023_v62 = vadd.f32 1.0, %v2642_v58 }
 0x13e   : > { %v2646_v0 = vpop.eup %2645  ;;  %2671 = vlog2.f32 %v1022_v59  ;;  %v1024_v1 = vadd.f32 1.0, %v2644_v61 }
 0x13f   : > { %v2648_v4 = vpop.eup %2647  ;;  %2673 = vlog2.f32 %v1023_v62  ;;  %v1025_v5 = vadd.f32 1.0, %v2646_v0 }
 0x140   : > { %v2650_v8 = vpop.eup %2649  ;;  %v1043_v9 = vmul.f32 0.6931472, %v2648_v4  ;;  %2675 = vlog2.f32 %v1024_v1 }
 0x141   : > { %v2652_v12 = vpop.eup %2651  ;;  %v1045_v13 = vmul.f32 0.6931472, %v2650_v8  ;;  %2677 = vlog2.f32 %v1025_v5 }
 0x142   : > { %v2654_v16 = vpop.eup %2653  ;;  %1106 = vst [vmem:[#allocation2 + $0xb0] sm:$0xff] %v1043_v9  ;;  %v1047_v17 = vmul.f32 0.6931472, %v2652_v12  ;;  %2679 = vpow2.f32 %v978_v2 }
 0x143   : > { %v2656_v20 = vpop.eup %2655  ;;  %1107 = vst [vmem:[#allocation2] sm:$0xff] %v1045_v13  ;;  %v1049_v21 = vmul.f32 0.6931472, %v2654_v16  ;;  %2681 = vpow2.f32 %v980_v6 }
 0x144   : > { %v2658_v24 = vpop.eup %2657  ;;  %1108 = vst [vmem:[#allocation2 + $0xd8] sm:$0xff] %v1047_v17  ;;  %v1051_v25 = vmul.f32 0.6931472, %v2656_v20  ;;  %2683 = vpow2.f32 %v982_v10 }
 0x145   : > { %v2660_v28 = vpop.eup %2659  ;;  %1109 = vst [vmem:[#allocation2 + $0x18] sm:$0xff] %v1049_v21  ;;  %v1053_v29 = vmul.f32 0.6931472, %v2658_v24  ;;  %2685 = vpow2.f32 %v984_v14 }
 0x146   : > { %v2662_v32 = vpop.eup %2661  ;;  %1110 = vst [vmem:[#allocation2 + $0x50] sm:$0xff] %v1051_v25  ;;  %v1055_v33 = vmul.f32 0.6931472, %v2660_v28  ;;  %2687 = vpow2.f32 %v986_v18  ;;  %v1138_v25 = vld [vmem:[#allocation16] sm:$0x1]  ;;  %v1145_v28 = vld [vmem:[#allocation19] sm:$0xff] }
 0x147   : > { %v2664_v36 = vpop.eup %2663  ;;  %1111 = vst [vmem:[#allocation2 + $0x68] sm:$0xff] %v1053_v29  ;;  %v1057_v37 = vmul.f32 0.6931472, %v2662_v32  ;;  %2689 = vpow2.f32 %v988_v22 }
 0x148   : > { %v2666_v40 = vpop.eup %2665  ;;  %1112 = vst [vmem:[#allocation2 + $0x30] sm:$0xff] %v1055_v33  ;;  %v1059_v41 = vmul.f32 0.6931472, %v2664_v36  ;;  %2691 = vpow2.f32 %v990_v26 }
 0x149   : > { %v2668_v44 = vpop.eup %2667  ;;  %1113 = vst [vmem:[#allocation2 + $0x48] sm:$0xff] %v1057_v37  ;;  %v1061_v45 = vmul.f32 0.6931472, %v2666_v40  ;;  %2693 = vpow2.f32 %v992_v30 }
 0x14a   : > { %v2670_v48 = vpop.eup %2669  ;;  %1114 = vst [vmem:[#allocation2 + $0x80] sm:$0xff] %v1059_v41  ;;  %v1063_v49 = vmul.f32 0.6931472, %v2668_v44  ;;  %2695 = vpow2.f32 %v994_v34  ;;  %v1139_v34 = vmul.f32 1.442695, %v1138_v25 }
 0x14b   : > { %v2672_v52 = vpop.eup %2671  ;;  %1115 = vst [vmem:[#allocation2 + $0x88] sm:$0xff] %v1061_v45  ;;  %v1065_v53 = vmul.f32 0.6931472, %v2670_v48  ;;  %2697 = vpow2.f32 %v996_v38  ;;  %v1161_v38 = vmul.f32 1.442695, %v1145_v28 }
 0x14c   : > { %v2674_v55 = vpop.eup %2673  ;;  %1116 = vst [vmem:[#allocation2 + $0xe8] sm:$0xff] %v1063_v49  ;;  %v1067_v56 = vmul.f32 0.6931472, %v2672_v52  ;;  %2699 = vpow2.f32 %v998_v42  ;;  %v1163_v42 = vmul.f32 1.442695, %v1146_v31 }
 0x14d   : > { %v2676_v58 = vpop.eup %2675  ;;  %1117 = vst [vmem:[#allocation2 + $0xb8] sm:$0xff] %v1065_v53  ;;  %v1069_v59 = vmul.f32 0.6931472, %v2674_v55  ;;  %2701 = vpow2.f32 %v1000_v46  ;;  %v1165_v46 = vmul.f32 1.442695, %v1147_v35  ;;  %v1152_v55 = vld [vmem:[#allocation19 + $0x38] sm:$0xff] }
 0x14e   : > { %v2678_v61 = vpop.eup %2677  ;;  %1118 = vst [vmem:[#allocation2 + $0x60] sm:$0xff] %v1067_v56  ;;  %v1071_v62 = vmul.f32 0.6931472, %v2676_v58  ;;  %2703 = vpow2.f32 %v1002_v50  ;;  %v1167_v50 = vmul.f32 1.442695, %v1148_v39 }
 0x14f   : > { %v2680_v63 = vpop.eup %2679  ;;  %1119 = vst [vmem:[#allocation2 + $0xf0] sm:$0xff] %v1069_v59  ;;  %v1073_v0 = vmul.f32 0.6931472, %v2678_v61  ;;  %2705 = vpow2.f32 %v1004_v54  ;;  %v1169_v54 = vmul.f32 1.442695, %v1149_v43  ;;  %v1153_v59 = vld [vmem:[#allocation19 + $0x40] sm:$0xff] }
 0x150   : > { %v2682_v1 = vpop.eup %2681  ;;  %1120 = vst [vmem:[#allocation2 + $0x8] sm:$0xff] %v1071_v62  ;;  %v1026_v2 = vadd.f32 1.0, %v2680_v63  ;;  %2707 = vpow2.f32 %v1006_v57  ;;  %v1171_v58 = vmul.f32 1.442695, %v1150_v47  ;;  %v1173_v62 = vmul.f32 1.442695, %v1151_v51 }
 0x151   : > { %v2684_v3 = vpop.eup %2683  ;;  %1121 = vst [vmem:[#allocation2 + $0x78] sm:$0xff] %v1073_v0  ;;  %v1027_v4 = vadd.f32 1.0, %v2682_v1  ;;  %2709 = vpow2.f32 %v1008_v60  ;;  %v1154_v63 = vld [vmem:[#allocation19 + $0x48] sm:$0xff] }
 0x152   : > { %v2686_v5 = vpop.eup %2685  ;;  %2711 = vlog2.f32 %v1026_v2  ;;  %v1028_v6 = vadd.f32 1.0, %v2684_v3  ;;  %v1175_v2 = vmul.f32 1.442695, %v1152_v55  ;;  %v1155_v3 = vld [vmem:[#allocation19 + $0x50] sm:$0xff] }
 0x153   : > { %v2688_v7 = vpop.eup %2687  ;;  %2713 = vlog2.f32 %v1027_v4  ;;  %v1029_v8 = vadd.f32 1.0, %v2686_v5 }
 0x154   : > { %v2690_v9 = vpop.eup %2689  ;;  %2715 = vlog2.f32 %v1028_v6  ;;  %v1030_v10 = vadd.f32 1.0, %v2688_v7  ;;  %v1177_v6 = vmul.f32 1.442695, %v1153_v59  ;;  %v1156_v7 = vld [vmem:[#allocation19 + $0x58] sm:$0xff] }
 0x155   : > { %v2692_v11 = vpop.eup %2691  ;;  %2717 = vlog2.f32 %v1029_v8  ;;  %v1031_v12 = vadd.f32 1.0, %v2690_v9 }
 0x156   : > { %v2694_v13 = vpop.eup %2693  ;;  %2719 = vlog2.f32 %v1030_v10  ;;  %v1032_v14 = vadd.f32 1.0, %v2692_v11  ;;  %v1179_v10 = vmul.f32 1.442695, %v1154_v63  ;;  %v1157_v11 = vld [vmem:[#allocation19 + $0x60] sm:$0xff] }
 0x157   : > { %v2696_v15 = vpop.eup %2695  ;;  %2721 = vlog2.f32 %v1031_v12  ;;  %v1033_v16 = vadd.f32 1.0, %v2694_v13  ;;  %v1264_v63 = vld [vmem:[#allocation23] sm:$0xff] }
 0x158   : > { %v2698_v17 = vpop.eup %2697  ;;  %2723 = vlog2.f32 %v1032_v14  ;;  %v1034_v18 = vadd.f32 1.0, %v2696_v15  ;;  %v1181_v14 = vmul.f32 1.442695, %v1155_v3  ;;  %v1158_v15 = vld [vmem:[#allocation19 + $0x68] sm:$0xff] }
 0x159   : > { %v2700_v19 = vpop.eup %2699  ;;  %2725 = vlog2.f32 %v1033_v16  ;;  %v1035_v20 = vadd.f32 1.0, %v2698_v17  ;;  %v1187_v25 = vmul.f32 1.442695, %v1158_v15  ;;  %v1265_v3 = vld [vmem:[#allocation23 + $0x8] sm:$0xff]  ;;  %v1268_v15 = vld [vmem:[#allocation23 + $0x20] sm:$0xff] }
 0x15a   : > { %v2702_v21 = vpop.eup %2701  ;;  %2727 = vlog2.f32 %v1034_v18  ;;  %v1036_v22 = vadd.f32 1.0, %v2700_v19  ;;  %v1183_v18 = vmul.f32 1.442695, %v1156_v7  ;;  %v1159_v19 = vld [vmem:[#allocation19 + $0x70] sm:$0xff] }
 0x15b   : > { %v2704_v23 = vpop.eup %2703  ;;  %2729 = vlog2.f32 %v1035_v20  ;;  %v1037_v24 = vadd.f32 1.0, %v2702_v21  ;;  %v1189_v28 = vmul.f32 1.442695, %v1159_v19  ;;  %v1266_v7 = vld [vmem:[#allocation23 + $0x10] sm:$0xff]  ;;  %v1269_v19 = vld [vmem:[#allocation23 + $0x28] sm:$0xff] }
 0x15c   : > { %v2706_v26 = vpop.eup %2705  ;;  %2731 = vlog2.f32 %v1036_v22  ;;  %v1038_v27 = vadd.f32 1.0, %v2704_v23  ;;  %v1185_v22 = vmul.f32 1.442695, %v1157_v11  ;;  %v1267_v11 = vld [vmem:[#allocation23 + $0x18] sm:$0xff] }
 0x15d   : > { %v2708_v29 = vpop.eup %2707  ;;  %2733 = vlog2.f32 %v1037_v24  ;;  %v1039_v30 = vadd.f32 1.0, %v2706_v26 }
 0x15e   : > { %v2710_v32 = vpop.eup %2709  ;;  %2735 = vlog2.f32 %v1038_v27  ;;  %v1040_v33 = vadd.f32 1.0, %v2708_v29 }
 0x15f   : > { %v2712_v36 = vpop.eup %2711  ;;  %2737 = vlog2.f32 %v1039_v30  ;;  %v1041_v37 = vadd.f32 1.0, %v2710_v32 }
 0x160   : > { %v2714_v40 = vpop.eup %2713  ;;  %v1075_v41 = vmul.f32 0.6931472, %v2712_v36  ;;  %2739 = vlog2.f32 %v1040_v33 }
 0x161   : > { %v2716_v44 = vpop.eup %2715  ;;  %v1077_v45 = vmul.f32 0.6931472, %v2714_v40  ;;  %2741 = vlog2.f32 %v1041_v37 }
 0x162   : > { %v2718_v48 = vpop.eup %2717  ;;  %1122 = vst [vmem:[#allocation2 + $0x38] sm:$0xff] %v1075_v41  ;;  %v1079_v49 = vmul.f32 0.6931472, %v2716_v44  ;;  %2743 = vpow2.f32 %v1139_v34 }
 0x163   : > { %v2720_v52 = vpop.eup %2719  ;;  %1123 = vst [vmem:[#allocation2 + $0x58] sm:$0xff] %v1077_v45  ;;  %v1081_v53 = vmul.f32 0.6931472, %v2718_v48  ;;  %2745 = vpow2.f32 %v1161_v38 }
 0x164   : > { %v2722_v56 = vpop.eup %2721  ;;  %1124 = vst [vmem:[#allocation2 + $0x40] sm:$0xff] %v1079_v49  ;;  %v1083_v57 = vmul.f32 0.6931472, %v2720_v52  ;;  %2747 = vpow2.f32 %v1163_v42 }
 0x165   : > { %v2724_v60 = vpop.eup %2723  ;;  %1125 = vst [vmem:[#allocation2 + $0xc8] sm:$0xff] %v1081_v53  ;;  %v1085_v61 = vmul.f32 0.6931472, %v2722_v56  ;;  %2749 = vpow2.f32 %v1165_v46 }
 0x166   : > { %v2726_v0 = vpop.eup %2725  ;;  %1126 = vst [vmem:[#allocation2 + $0xe0] sm:$0xff] %v1083_v57  ;;  %v1087_v1 = vmul.f32 0.6931472, %v2724_v60  ;;  %2751 = vpow2.f32 %v1167_v50  ;;  %v1160_v57 = vld [vmem:[#allocation19 + $0x78] sm:$0xff]  ;;  %v1257_v60 = vld [vmem:[%s4109_s25] sm:$0x1] }
 0x167   : > { %v2728_v4 = vpop.eup %2727  ;;  %1127 = vst [vmem:[#allocation2 + $0x90] sm:$0xff] %v1085_v61  ;;  %v1089_v5 = vmul.f32 0.6931472, %v2726_v0  ;;  %2753 = vpow2.f32 %v1169_v54 }
 0x168   : > { %v2730_v8 = vpop.eup %2729  ;;  %1128 = vst [vmem:[#allocation2 + $0x70] sm:$0xff] %v1087_v1  ;;  %v1091_v9 = vmul.f32 0.6931472, %v2728_v4  ;;  %2755 = vpow2.f32 %v1171_v58 }
 0x169   : > { %v2732_v12 = vpop.eup %2731  ;;  %1129 = vst [vmem:[#allocation2 + $0xc0] sm:$0xff] %v1089_v5  ;;  %v1093_v13 = vmul.f32 0.6931472, %v2730_v8  ;;  %2757 = vpow2.f32 %v1173_v62 }
 0x16a   : > { %v2734_v16 = vpop.eup %2733  ;;  %1130 = vst [vmem:[#allocation2 + $0xa8] sm:$0xff] %v1091_v9  ;;  %v1095_v17 = vmul.f32 0.6931472, %v2732_v12  ;;  %2759 = vpow2.f32 %v1175_v2  ;;  %v1191_v2 = vmul.f32 1.442695, %v1160_v57 }
 0x16b   : > { %v2736_v20 = vpop.eup %2735  ;;  %1131 = vst [vmem:[#allocation2 + $0xd0] sm:$0xff] %v1093_v13  ;;  %v1097_v21 = vmul.f32 0.6931472, %v2734_v16  ;;  %2761 = vpow2.f32 %v1177_v6  ;;  %v1258_v6 = vmul.f32 1.442695, %v1257_v60 }
 0x16c   : > { %v2738_v23 = vpop.eup %2737  ;;  %1132 = vst [vmem:[#allocation2 + $0x10] sm:$0xff] %v1095_v17  ;;  %v1099_v24 = vmul.f32 0.6931472, %v2736_v20  ;;  %2763 = vpow2.f32 %v1179_v10  ;;  %v1280_v10 = vmul.f32 1.442695, %v1264_v63 }
 0x16d   : > { %v2740_v26 = vpop.eup %2739  ;;  %1133 = vst [vmem:[#allocation2 + $0x28] sm:$0xff] %v1097_v21  ;;  %v1101_v27 = vmul.f32 0.6931472, %v2738_v23  ;;  %2765 = vpow2.f32 %v1181_v14  ;;  %v1282_v14 = vmul.f32 1.442695, %v1265_v3  ;;  %v1270_v23 = vld [vmem:[#allocation23 + $0x30] sm:$0xff] }
 0x16e   : > { %v2742_v29 = vpop.eup %2741  ;;  %1134 = vst [vmem:[#allocation2 + $0xa0] sm:$0xff] %v1099_v24  ;;  %v1103_v30 = vmul.f32 0.6931472, %v2740_v26  ;;  %2767 = vpow2.f32 %v1183_v18  ;;  %v1284_v18 = vmul.f32 1.442695, %v1266_v7 }
 0x16f   : > { %v2744_v31 = vpop.eup %2743  ;;  %1135 = vst [vmem:[#allocation2 + $0xf8] sm:$0xff] %v1101_v27  ;;  %v1105_v32 = vmul.f32 0.6931472, %v2742_v29  ;;  %2769 = vpow2.f32 %v1185_v22  ;;  %v1286_v22 = vmul.f32 1.442695, %v1267_v11  ;;  %v1271_v27 = vld [vmem:[#allocation23 + $0x38] sm:$0xff] }
 0x170   : > { %v2746_v33 = vpop.eup %2745  ;;  %1136 = vst [vmem:[#allocation2 + $0x20] sm:$0xff] %v1103_v30  ;;  %v1141_v34 = vadd.f32 1.0, %v2744_v31  ;;  %2771 = vpow2.f32 %v1187_v25  ;;  %v1288_v26 = vmul.f32 1.442695, %v1268_v15  ;;  %v1290_v30 = vmul.f32 1.442695, %v1269_v19 }
 0x171   : > { %v2748_v35 = vpop.eup %2747  ;;  %1137 = vst [vmem:[#allocation2 + $0x98] sm:$0xff] %v1105_v32  ;;  %v1193_v36 = vadd.f32 1.0, %v2746_v33  ;;  %2773 = vpow2.f32 %v1189_v28  ;;  %v1272_v31 = vld [vmem:[#allocation23 + $0x40] sm:$0xff] }
 0x172   : > { %v2750_v37 = vpop.eup %2749  ;;  %2775 = vlog2.f32 %v1141_v34  ;;  %v1194_v38 = vadd.f32 1.0, %v2748_v35  ;;  %v1292_v34 = vmul.f32 1.442695, %v1270_v23  ;;  %v1273_v35 = vld [vmem:[#allocation23 + $0x48] sm:$0xff] }
 0x173   : > { %v2752_v39 = vpop.eup %2751  ;;  %2777 = vlog2.f32 %v1193_v36  ;;  %v1195_v40 = vadd.f32 1.0, %v2750_v37 }
 0x174   : > { %v2754_v41 = vpop.eup %2753  ;;  %2779 = vlog2.f32 %v1194_v38  ;;  %v1196_v42 = vadd.f32 1.0, %v2752_v39  ;;  %v1294_v38 = vmul.f32 1.442695, %v1271_v27  ;;  %v1274_v39 = vld [vmem:[#allocation23 + $0x50] sm:$0xff] }
 0x175   : > { %v2756_v43 = vpop.eup %2755  ;;  %2781 = vlog2.f32 %v1195_v40  ;;  %v1197_v44 = vadd.f32 1.0, %v2754_v41 }
 0x176   : > { %v2758_v45 = vpop.eup %2757  ;;  %2783 = vlog2.f32 %v1196_v42  ;;  %v1198_v46 = vadd.f32 1.0, %v2756_v43  ;;  %v1296_v42 = vmul.f32 1.442695, %v1272_v31  ;;  %v1275_v43 = vld [vmem:[#allocation23 + $0x58] sm:$0xff]  ;;  %v1376_v31 = vld [vmem:[%s4110_s27] sm:$0x1] }
 0x177   : > { %v2760_v47 = vpop.eup %2759  ;;  %2785 = vlog2.f32 %v1197_v44  ;;  %v1199_v48 = vadd.f32 1.0, %v2758_v45 }
 0x178   : > { %v2762_v49 = vpop.eup %2761  ;;  %2787 = vlog2.f32 %v1198_v46  ;;  %v1200_v50 = vadd.f32 1.0, %v2760_v47  ;;  %v1298_v46 = vmul.f32 1.442695, %v1273_v35  ;;  %v1276_v47 = vld [vmem:[#allocation23 + $0x60] sm:$0xff] }
 0x179   : > { %v2764_v51 = vpop.eup %2763  ;;  %2789 = vlog2.f32 %v1199_v48  ;;  %v1201_v52 = vadd.f32 1.0, %v2762_v49  ;;  %v1304_v57 = vmul.f32 1.442695, %v1276_v47 }
 0x17a   : > { %v2766_v53 = vpop.eup %2765  ;;  %2791 = vlog2.f32 %v1200_v50  ;;  %v1202_v54 = vadd.f32 1.0, %v2764_v51  ;;  %v1300_v50 = vmul.f32 1.442695, %v1274_v39  ;;  %v1277_v51 = vld [vmem:[#allocation23 + $0x68] sm:$0xff] }
 0x17b   : > { %v2768_v55 = vpop.eup %2767  ;;  %2793 = vlog2.f32 %v1201_v52  ;;  %v1203_v56 = vadd.f32 1.0, %v2766_v53  ;;  %v1306_v60 = vmul.f32 1.442695, %v1277_v51 }
 0x17c   : > { %v2770_v58 = vpop.eup %2769  ;;  %2795 = vlog2.f32 %v1202_v54  ;;  %v1204_v59 = vadd.f32 1.0, %v2768_v55  ;;  %v1302_v54 = vmul.f32 1.442695, %v1275_v43 }
 0x17d   : > { %v2772_v61 = vpop.eup %2771  ;;  %2797 = vlog2.f32 %v1203_v56  ;;  %v1205_v62 = vadd.f32 1.0, %v2770_v58 }
 0x17e   : > { %v2774_v0 = vpop.eup %2773  ;;  %2799 = vlog2.f32 %v1204_v59  ;;  %v1206_v1 = vadd.f32 1.0, %v2772_v61 }
 0x17f   : > { %v2776_v4 = vpop.eup %2775  ;;  %2801 = vlog2.f32 %v1205_v62  ;;  %v1207_v5 = vadd.f32 1.0, %v2774_v0 }
 0x180   : > { %v2778_v8 = vpop.eup %2777  ;;  %v1143_v9 = vmul.f32 0.6931472, %v2776_v4  ;;  %2803 = vlog2.f32 %v1206_v1 }
 0x181   : > { %v2780_v12 = vpop.eup %2779  ;;  %v1210_v13 = vmul.f32 0.6931472, %v2778_v8  ;;  %2805 = vlog2.f32 %v1207_v5 }
 0x182   : > { %v2782_v16 = vpop.eup %2781  ;;  %1144 = vst [vmem:[#allocation3] sm:$0x1] %v1143_v9  ;;  %v1212_v17 = vmul.f32 0.6931472, %v2780_v12  ;;  %2807 = vpow2.f32 %v1191_v2 }
 0x183   : > { %v2784_v20 = vpop.eup %2783  ;;  %1241 = vst [vmem:[#allocation4] sm:$0xff] %v1210_v13  ;;  %v1214_v21 = vmul.f32 0.6931472, %v2782_v16  ;;  %2809 = vpow2.f32 %v1258_v6 }
 0x184   : > { %v2786_v24 = vpop.eup %2785  ;;  %1242 = vst [vmem:[#allocation4 + $0x48] sm:$0xff] %v1212_v17  ;;  %v1216_v25 = vmul.f32 0.6931472, %v2784_v20  ;;  %2811 = vpow2.f32 %v1280_v10 }
 0x185   : > { %v2788_v28 = vpop.eup %2787  ;;  %1243 = vst [vmem:[#allocation4 + $0x68] sm:$0xff] %v1214_v21  ;;  %v1218_v29 = vmul.f32 0.6931472, %v2786_v24  ;;  %2813 = vpow2.f32 %v1282_v14 }
 0x186   : > { %v2790_v32 = vpop.eup %2789  ;;  %1244 = vst [vmem:[#allocation4 + $0x78] sm:$0xff] %v1216_v25  ;;  %v1220_v33 = vmul.f32 0.6931472, %v2788_v28  ;;  %2815 = vpow2.f32 %v1284_v18  ;;  %v1278_v25 = vld [vmem:[#allocation23 + $0x70] sm:$0xff]  ;;  %v1279_v28 = vld [vmem:[#allocation23 + $0x78] sm:$0xff] }
 0x187   : > { %v2792_v36 = vpop.eup %2791  ;;  %1245 = vst [vmem:[#allocation4 + $0x8] sm:$0xff] %v1218_v29  ;;  %v1222_v37 = vmul.f32 0.6931472, %v2790_v32  ;;  %2817 = vpow2.f32 %v1286_v22 }
 0x188   : > { %v2794_v40 = vpop.eup %2793  ;;  %1246 = vst [vmem:[#allocation4 + $0x50] sm:$0xff] %v1220_v33  ;;  %v1224_v41 = vmul.f32 0.6931472, %v2792_v36  ;;  %2819 = vpow2.f32 %v1288_v26 }
 0x189   : > { %v2796_v44 = vpop.eup %2795  ;;  %1247 = vst [vmem:[#allocation4 + $0x40] sm:$0xff] %v1222_v37  ;;  %v1226_v45 = vmul.f32 0.6931472, %v2794_v40  ;;  %2821 = vpow2.f32 %v1290_v30  ;;  %v1310_v37 = vmul.f32 1.442695, %v1279_v28 }
 0x18a   : > { %v2798_v48 = vpop.eup %2797  ;;  %1248 = vst [vmem:[#allocation4 + $0x38] sm:$0xff] %v1224_v41  ;;  %v1228_v49 = vmul.f32 0.6931472, %v2796_v44  ;;  %2823 = vpow2.f32 %v1292_v34  ;;  %v1308_v34 = vmul.f32 1.442695, %v1278_v25 }
 0x18b   : > { %v2800_v52 = vpop.eup %2799  ;;  %1249 = vst [vmem:[#allocation4 + $0x70] sm:$0xff] %v1226_v45  ;;  %v1230_v53 = vmul.f32 0.6931472, %v2798_v48  ;;  %2825 = vpow2.f32 %v1294_v38  ;;  %v1377_v40 = vmul.f32 1.442695, %v1376_v31 }
 0x18c   : > { %v2802_v55 = vpop.eup %2801  ;;  %1250 = vst [vmem:[#allocation4 + $0x60] sm:$0xff] %v1228_v49  ;;  %v1232_v56 = vmul.f32 0.6931472, %v2800_v52  ;;  %2827 = vpow2.f32 %v1296_v42 }
 0x18d   : > { %v2804_v58 = vpop.eup %2803  ;;  %1251 = vst [vmem:[#allocation4 + $0x18] sm:$0xff] %v1230_v53  ;;  %v1234_v59 = vmul.f32 0.6931472, %v2802_v55  ;;  %2829 = vpow2.f32 %v1298_v46 }
 0x18e   : > { %v2806_v61 = vpop.eup %2805  ;;  %1252 = vst [vmem:[#allocation4 + $0x20] sm:$0xff] %v1232_v56  ;;  %v1236_v62 = vmul.f32 0.6931472, %v2804_v58  ;;  %2831 = vpow2.f32 %v1300_v50 }
 0x18f   : > { %v2808_v63 = vpop.eup %2807  ;;  %1253 = vst [vmem:[#allocation4 + $0x10] sm:$0xff] %v1234_v59  ;;  %v1238_v0 = vmul.f32 0.6931472, %v2806_v61  ;;  %2833 = vpow2.f32 %v1302_v54 }
 0x190   : > { %v2810_v1 = vpop.eup %2809  ;;  %1254 = vst [vmem:[#allocation4 + $0x30] sm:$0xff] %v1236_v62  ;;  %v1208_v2 = vadd.f32 1.0, %v2808_v63  ;;  %2835 = vpow2.f32 %v1304_v57 }
 0x191   : > { %v2812_v3 = vpop.eup %2811  ;;  %1255 = vst [vmem:[#allocation4 + $0x28] sm:$0xff] %v1238_v0  ;;  %v1260_v4 = vadd.f32 1.0, %v2810_v1  ;;  %2837 = vpow2.f32 %v1306_v60 }
 0x192   : > { %v2814_v5 = vpop.eup %2813  ;;  %2839 = vlog2.f32 %v1208_v2  ;;  %v1312_v6 = vadd.f32 1.0, %v2812_v3 }
 0x193   : > { %v2816_v7 = vpop.eup %2815  ;;  %2841 = vlog2.f32 %v1260_v4  ;;  %v1313_v8 = vadd.f32 1.0, %v2814_v5 }
 0x194   : > { %v2818_v9 = vpop.eup %2817  ;;  %2843 = vlog2.f32 %v1312_v6  ;;  %v1314_v10 = vadd.f32 1.0, %v2816_v7 }
 0x195   : > { %v2820_v11 = vpop.eup %2819  ;;  %2845 = vlog2.f32 %v1313_v8  ;;  %v1315_v12 = vadd.f32 1.0, %v2818_v9 }
 0x196   : > { %v2822_v13 = vpop.eup %2821  ;;  %2847 = vlog2.f32 %v1314_v10  ;;  %v1316_v14 = vadd.f32 1.0, %v2820_v11 }
 0x197   : > { %v2824_v15 = vpop.eup %2823  ;;  %2849 = vlog2.f32 %v1315_v12  ;;  %v1317_v16 = vadd.f32 1.0, %v2822_v13 }
 0x198   : > { %v2826_v17 = vpop.eup %2825  ;;  %2851 = vlog2.f32 %v1316_v14  ;;  %v1318_v18 = vadd.f32 1.0, %v2824_v15 }
 0x199   : > { %v2828_v19 = vpop.eup %2827  ;;  %2853 = vlog2.f32 %v1317_v16  ;;  %v1319_v20 = vadd.f32 1.0, %v2826_v17 }
 0x19a   : > { %v2830_v21 = vpop.eup %2829  ;;  %2855 = vlog2.f32 %v1318_v18  ;;  %v1320_v22 = vadd.f32 1.0, %v2828_v19 }
 0x19b   : > { %v2832_v23 = vpop.eup %2831  ;;  %2857 = vlog2.f32 %v1319_v20  ;;  %v1321_v24 = vadd.f32 1.0, %v2830_v21 }
 0x19c   : > { %v2834_v26 = vpop.eup %2833  ;;  %2859 = vlog2.f32 %v1320_v22  ;;  %v1322_v27 = vadd.f32 1.0, %v2832_v23 }
 0x19d   : > { %v2836_v29 = vpop.eup %2835  ;;  %2861 = vlog2.f32 %v1321_v24  ;;  %v1323_v30 = vadd.f32 1.0, %v2834_v26 }
 0x19e   : > { %v2838_v32 = vpop.eup %2837  ;;  %2863 = vlog2.f32 %v1322_v27  ;;  %v1324_v33 = vadd.f32 1.0, %v2836_v29 }
 0x19f   : > { %v2840_v35 = vpop.eup %2839  ;;  %2865 = vlog2.f32 %v1323_v30  ;;  %v1325_v36 = vadd.f32 1.0, %v2838_v32 }
 0x1a0   : > { %v2842_v38 = vpop.eup %2841  ;;  %v1240_v39 = vmul.f32 0.6931472, %v2840_v35  ;;  %2867 = vlog2.f32 %v1324_v33 }
 0x1a1   : > { %v2844_v41 = vpop.eup %2843  ;;  %v1262_v42 = vmul.f32 0.6931472, %v2842_v38  ;;  %2869 = vlog2.f32 %v1325_v36 }
 0x1a2   : > { %v2846_v43 = vpop.eup %2845  ;;  %1256 = vst [vmem:[#allocation4 + $0x58] sm:$0xff] %v1240_v39  ;;  %v1329_v44 = vmul.f32 0.6931472, %v2844_v41  ;;  %2871 = vpow2.f32 %v1308_v34 }
 0x1a3   : > { %v2848_v45 = vpop.eup %2847  ;;  %1263 = vst [vmem:[#allocation5] sm:$0x1] %v1262_v42  ;;  %v1331_v46 = vmul.f32 0.6931472, %v2846_v43  ;;  %2873 = vpow2.f32 %v1310_v37 }
 0x1a4   : > { %v2850_v47 = vpop.eup %2849  ;;  %1360 = vst [vmem:[#allocation6 + $0x18] sm:$0xff] %v1329_v44  ;;  %v1333_v48 = vmul.f32 0.6931472, %v2848_v45  ;;  %2875 = vpow2.f32 %v1377_v40 }
 0x1a5   : > { %v2852_v49 = vpop.eup %2851  ;;  %1361 = vst [vmem:[#allocation6 + $0x10] sm:$0xff] %v1331_v46  ;;  %v1335_v50 = vmul.f32 0.6931472, %v2850_v47 }
 0x1a6   : > { %v2854_v51 = vpop.eup %2853  ;;  %1362 = vst [vmem:[#allocation6 + $0x48] sm:$0xff] %v1333_v48  ;;  %v1337_v52 = vmul.f32 0.6931472, %v2852_v49 }
 0x1a7   : > { %v2856_v53 = vpop.eup %2855  ;;  %1363 = vst [vmem:[#allocation6 + $0x70] sm:$0xff] %v1335_v50  ;;  %v1339_v54 = vmul.f32 0.6931472, %v2854_v51 }
 0x1a8   : > { %v2858_v55 = vpop.eup %2857  ;;  %1364 = vst [vmem:[#allocation6 + $0x8] sm:$0xff] %v1337_v52  ;;  %v1341_v56 = vmul.f32 0.6931472, %v2856_v53 }
 0x1a9   : > { %v2860_v57 = vpop.eup %2859  ;;  %1365 = vst [vmem:[#allocation6 + $0x40] sm:$0xff] %v1339_v54  ;;  %v1343_v58 = vmul.f32 0.6931472, %v2858_v55 }
 0x1aa   : > { %v2862_v59 = vpop.eup %2861  ;;  %1366 = vst [vmem:[#allocation6 + $0x68] sm:$0xff] %v1341_v56  ;;  %v1345_v60 = vmul.f32 0.6931472, %v2860_v57 }
 0x1ab   : > { %v2864_v61 = vpop.eup %2863  ;;  %1367 = vst [vmem:[#allocation6 + $0x58] sm:$0xff] %v1343_v58  ;;  %v1347_v62 = vmul.f32 0.6931472, %v2862_v59 }
 0x1ac   : > { %v2866_v63 = vpop.eup %2865  ;;  %1368 = vst [vmem:[#allocation6 + $0x28] sm:$0xff] %v1345_v60  ;;  %v1349_v0 = vmul.f32 0.6931472, %v2864_v61 }
 0x1ad   : > { %v2868_v1 = vpop.eup %2867  ;;  %1369 = vst [vmem:[#allocation6] sm:$0xff] %v1347_v62  ;;  %v1351_v2 = vmul.f32 0.6931472, %v2866_v63 }
 0x1ae   : > { %v2870_v3 = vpop.eup %2869  ;;  %1370 = vst [vmem:[#allocation6 + $0x38] sm:$0xff] %v1349_v0  ;;  %v1353_v4 = vmul.f32 0.6931472, %v2868_v1 }
 0x1af   : > { %v2872_v5 = vpop.eup %2871  ;;  %1371 = vst [vmem:[#allocation6 + $0x78] sm:$0xff] %v1351_v2  ;;  %v1355_v6 = vmul.f32 0.6931472, %v2870_v3 }
 0x1b0   : > { %v2874_v7 = vpop.eup %2873  ;;  %1372 = vst [vmem:[#allocation6 + $0x30] sm:$0xff] %v1353_v4  ;;  %v1326_v8 = vadd.f32 1.0, %v2872_v5 }
 0x1b1   : > { %v2876_v9 = vpop.eup %2875  ;;  %1373 = vst [vmem:[#allocation6 + $0x50] sm:$0xff] %v1355_v6  ;;  %v1327_v10 = vadd.f32 1.0, %v2874_v7 }
 0x1b2   : > { %2877 = vlog2.f32 %v1326_v8  ;;  %v1379_v11 = vadd.f32 1.0, %v2876_v9 }
 0x1b3   : > { %2879 = vlog2.f32 %v1327_v10 }
 0x1b4   : > { %2881 = vlog2.f32 %v1379_v11 }
 0x1bf   : > { %v2878_v12 = vpop.eup %2877 }
 0x1c0   : > { %v2880_v13 = vpop.eup %2879  ;;  %v1357_v14 = vmul.f32 0.6931472, %v2878_v12 }
 0x1c1   : > { %v2882_v15 = vpop.eup %2881  ;;  %v1359_v16 = vmul.f32 0.6931472, %v2880_v13 }
 0x1c2   : > { %1374 = vst [vmem:[#allocation6 + $0x20] sm:$0xff] %v1357_v14  ;;  %v1381_v17 = vmul.f32 0.6931472, %v2882_v15 }
 0x1c3   : > { %1375 = vst [vmem:[#allocation6 + $0x60] sm:$0xff] %v1359_v16 }
 0x1c4   : > { %1382 = vst [vmem:[#allocation7] sm:$0x1] %v1381_v17 }
 0x1c5 PF: > { %v1416_v18 = vld [vmem:[#allocation11 + $0xf8] sm:$0xff]  ;;  %v1448_v19 = vld [vmem:[#allocation2 + $0x98] sm:$0xff]  ;;  %v3366_v25 = vmov 0.0   ;;  %v1415_v27 = vld [vmem:[#allocation11 + $0xf0] sm:$0xff]  ;;  %vm3367_vm0 = vmmov 0   ;;  %s4114_s5 = sld [smem:[#allocation43_spill]] }
 0x1c6   : > { %v1480_v20 = vld [vmem:[%s3788_s12 + $0xf8] sm:$0xff]  ;;  %2379 = vmatprep.subr.mxu1 %v3366_v25  ;;  %v1447_v28 = vld [vmem:[#allocation2 + $0x20] sm:$0xff]  ;;  %v1479_v29 = vld [vmem:[%s3788_s12 + $0xf0] sm:$0xff]  ;;  %2411 = vmatprep.mubr.msk.f32.mxu1 %vm3367_vm0, %v3366_v25  ;;  %s2303_s28 = sshll.u32 %s3496_s3, 7  ;;  %s4115_s30 = sld [smem:[#allocation59_spill]] }
 0x1c7   : > { %v1512_v21 = vmul.f32 %v1480_v20, %v1448_v19  ;;  %v1400_v22 = vld [vmem:[#allocation11 + $0x78] sm:$0xff]  ;;  %v1432_v23 = vld [vmem:[#allocation2 + $0x78] sm:$0xff]  ;;  %v1511_v31 = vmul.f32 %v1479_v29, %v1447_v28  ;;  %v1399_v32 = vld [vmem:[#allocation11 + $0x70] sm:$0xff]  ;;  %s1998_s27 = sshll.u32 %s3818_s4, 4  ;;  %s1999_s27 = int_to_ptr.vmem [resolvable:$true] %s1998_s27 }
 0x1c8   : > { %v1464_v24 = vld [vmem:[%s3788_s12 + $0x78] sm:$0xff]  ;;  %v1431_v33 = vld [vmem:[#allocation2 + $0x8] sm:$0xff]  ;;  %v1414_v37 = vld [vmem:[#allocation11 + $0xe8] sm:$0xff]  ;;  %s3231_s8 = scalar_lea.vmem %s1999_s27, 128 }
 0x1c9   : > { %v1496_v26 = vmul.f32 %v1464_v24, %v1432_v23  ;;  %v1544_v30 = vadd.f32 %v1512_v21, %v1416_v18  ;;  %v1463_v34 = vld [vmem:[%s3788_s12 + $0x70] sm:$0xff]  ;;  %v1446_v38 = vld [vmem:[#allocation2 + $0xf8] sm:$0xff]  ;;  %v1478_v39 = vld [vmem:[%s3788_s12 + $0xe8] sm:$0xff]  ;;  %v1543_v40 = vadd.f32 %v1511_v31, %v1415_v27  ;;  %p3232_p2 = scmp.ne.s32.totalorder %s1999_s27, %s3231_s8 }
 0x1ca   : > { %v1495_v36 = vmul.f32 %v1463_v34, %v1431_v33  ;;  %v1510_v41 = vmul.f32 %v1478_v39, %v1446_v38  ;;  %v1398_v42 = vld [vmem:[#allocation11 + $0x68] sm:$0xff]  ;;  %v1430_v43 = vld [vmem:[#allocation2 + $0xf0] sm:$0xff]  ;;  %v1444_v58 = vld [vmem:[#allocation2 + $0x28] sm:$0xff] }
 0x1cb   : > { %v1528_v35 = vadd.f32 %v1496_v26, %v1400_v22  ;;  %2310 = vmatprep.subr.mxu0 %v1544_v30  ;;  %v1462_v44 = vld [vmem:[%s3788_s12 + $0x68] sm:$0xff]  ;;  %v1413_v47 = vld [vmem:[#allocation11 + $0xe0] sm:$0xff]  ;;  %v1412_v57 = vld [vmem:[#allocation11 + $0xd8] sm:$0xff]  ;;  %p4116_p8 = scmp.ne.s32.totalorder %s4114_s5, 0 }
 0x1cc   : > { %v1527_v45 = vadd.f32 %v1495_v36, %v1399_v32  ;;  %v1494_v46 = vmul.f32 %v1462_v44, %v1430_v43  ;;  %v1445_v48 = vld [vmem:[#allocation2 + $0xa0] sm:$0xff]  ;;  %v1542_v50 = vadd.f32 %v1510_v41, %v1414_v37  ;;  %v1397_v52 = vld [vmem:[#allocation11 + $0x60] sm:$0xff]  ;;  %v1396_v62 = vld [vmem:[#allocation11 + $0x58] sm:$0xff]  ;;  %s1996_s0 = scalar_lea.hbm %s4115_s30, %s2303_s28 }
 0x1cd   : > { %2311 = vmatpush3.msra.mxu0 %v1528_v35  ;;  %v1477_v49 = vld [vmem:[%s3788_s12 + $0xe0] sm:$0xff]  ;;  %v1476_v59 = vld [vmem:[%s3788_s12 + $0xd8] sm:$0xff]  ;;  %v1411_v3 = vld [vmem:[#allocation11 + $0xd0] sm:$0xff]  ;;  %p3233_p11 = pnand %p3232_p2, %p4116_p8 }
 0x1ce   : > { %2312 = vmatprep.subr.mxu0 %v1543_v40  ;;  %v1509_v51 = vmul.f32 %v1477_v49, %v1445_v48  ;;  %v1429_v53 = vld [vmem:[#allocation2 + $0x60] sm:$0xff]  ;;  %v1526_v55 = vadd.f32 %v1494_v46, %v1398_v42  ;;  %v1508_v61 = vmul.f32 %v1476_v59, %v1444_v58  ;;  %v1428_v63 = vld [vmem:[#allocation2 + $0xb8] sm:$0xff]  ;;  %v1443_v4 = vld [vmem:[#allocation2 + $0x10] sm:$0xff] }
 0x1cf   : > { %v1461_v54 = vld [vmem:[%s3788_s12 + $0x60] sm:$0xff]  ;;  %2313 = vmatpush3.msra.mxu0 %v1527_v45  ;;  %v1460_v0 = vld [vmem:[%s3788_s12 + $0x58] sm:$0xff]  ;;  %v1475_v5 = vld [vmem:[%s3788_s12 + $0xd0] sm:$0xff]  ;;  %p3234_p1 = pneg %p3233_p11 }
 0x1d0   : > { %v1493_v56 = vmul.f32 %v1461_v54, %v1429_v53  ;;  %2314 = vmatprep.subr.mxu0 %v1542_v50  ;;  %v1541_v60 = vadd.f32 %v1509_v51, %v1413_v47  ;;  %v1492_v2 = vmul.f32 %v1460_v0, %v1428_v63  ;;  %v1540_v6 = vadd.f32 %v1508_v61, %v1412_v57  ;;  %v1395_v8 = vld [vmem:[#allocation11 + $0x50] sm:$0xff]  ;;  %v1410_v13 = vld [vmem:[#allocation11 + $0xc8] sm:$0xff]  ;;  %v1442_v14 = vld [vmem:[#allocation2 + $0xd0] sm:$0xff] }
 0x1d1   : > { %2315 = vmatpush3.msra.mxu0 %v1526_v55  ;;  %v1507_v7 = vmul.f32 %v1475_v5, %v1443_v4  ;;  %v1427_v9 = vld [vmem:[#allocation2 + $0xe8] sm:$0xff]  ;;  %v1394_v18 = vld [vmem:[#allocation11 + $0x48] sm:$0xff]  ;;  %v1409_v23 = vld [vmem:[#allocation11 + $0xc0] sm:$0xff] }
 0x1d2   : > { %v1525_v1 = vadd.f32 %v1493_v56, %v1397_v52  ;;  %2316 = vmatprep.subr.mxu0 %v1541_v60  ;;  %v1459_v10 = vld [vmem:[%s3788_s12 + $0x50] sm:$0xff]  ;;  %v1524_v11 = vadd.f32 %v1492_v2, %v1396_v62  ;;  %v1474_v15 = vld [vmem:[%s3788_s12 + $0xc8] sm:$0xff]  ;;  %v1473_v26 = vld [vmem:[%s3788_s12 + $0xc0] sm:$0xff] }
 0x1d3   : > { %v1491_v12 = vmul.f32 %v1459_v10, %v1427_v9  ;;  %v1539_v16 = vadd.f32 %v1507_v7, %v1411_v3  ;;  %v1506_v17 = vmul.f32 %v1474_v15, %v1442_v14  ;;  %v1426_v19 = vld [vmem:[#allocation2 + $0x88] sm:$0xff]  ;;  %v1393_v29 = vld [vmem:[#allocation11 + $0x40] sm:$0xff]  ;;  %v1425_v30 = vld [vmem:[#allocation2 + $0x80] sm:$0xff] }
 0x1d4   : > { %2317 = vmatpush3.msra.mxu0 %v1525_v1  ;;  %v1458_v20 = vld [vmem:[%s3788_s12 + $0x48] sm:$0xff]  ;;  %v1457_v31 = vld [vmem:[%s3788_s12 + $0x40] sm:$0xff]  ;;  %v1408_v34 = vld [vmem:[#allocation11 + $0xb8] sm:$0xff] }
 0x1d5   : > { %2318 = vmatprep.subr.mxu0 %v1540_v6  ;;  %v1523_v21 = vadd.f32 %v1491_v12, %v1395_v8  ;;  %v1490_v22 = vmul.f32 %v1458_v20, %v1426_v19  ;;  %v1441_v24 = vld [vmem:[#allocation2 + $0xa8] sm:$0xff]  ;;  %v1538_v27 = vadd.f32 %v1506_v17, %v1410_v13  ;;  %v1489_v33 = vmul.f32 %v1457_v31, %v1425_v30  ;;  %v1440_v35 = vld [vmem:[#allocation2 + $0xc0] sm:$0xff]  ;;  %v1472_v36 = vld [vmem:[%s3788_s12 + $0xb8] sm:$0xff] }
 0x1d6   : > { %2319 = vmatpush3.msra.mxu0 %v1524_v11  ;;  %v1505_v28 = vmul.f32 %v1473_v26, %v1441_v24  ;;  %v1504_v38 = vmul.f32 %v1472_v36, %v1440_v35  ;;  %v1392_v39 = vld [vmem:[#allocation11 + $0x38] sm:$0xff]  ;;  %v1407_v44 = vld [vmem:[#allocation11 + $0xb0] sm:$0xff]  ;;  %v1406_v54 = vld [vmem:[#allocation11 + $0xa8] sm:$0xff] }
 0x1d7   : > { %2320 = vmatprep.subr.mxu0 %v1539_v16  ;;  %v1522_v32 = vadd.f32 %v1490_v22, %v1394_v18  ;;  %v1424_v40 = vld [vmem:[#allocation2 + $0x48] sm:$0xff]  ;;  %v1456_v41 = vld [vmem:[%s3788_s12 + $0x38] sm:$0xff]  ;;  %v1521_v42 = vadd.f32 %v1489_v33, %v1393_v29  ;;  %v1390_v59 = vld [vmem:[#allocation11 + $0x28] sm:$0xff] }
 0x1d8   : > { %2321 = vmatpush3.msra.mxu0 %v1523_v21  ;;  %v1537_v37 = vadd.f32 %v1505_v28, %v1409_v23  ;;  %v1488_v43 = vmul.f32 %v1456_v41, %v1424_v40  ;;  %v1439_v45 = vld [vmem:[#allocation2 + $0x70] sm:$0xff]  ;;  %v1536_v47 = vadd.f32 %v1504_v38, %v1408_v34  ;;  %v1391_v49 = vld [vmem:[#allocation11 + $0x30] sm:$0xff]  ;;  %v1469_v2 = vld [vmem:[%s3788_s12 + $0xa0] sm:$0xff] }
 0x1d9   : > { %2322 = vmatprep.subr.mxu0 %v1538_v27  ;;  %v1471_v46 = vld [vmem:[%s3788_s12 + $0xb0] sm:$0xff]  ;;  %v1470_v56 = vld [vmem:[%s3788_s12 + $0xa8] sm:$0xff]  ;;  %v1405_v0 = vld [vmem:[#allocation11 + $0xa0] sm:$0xff] }
 0x1da   : > { %2323 = vmatpush3.msra.mxu0 %v1522_v32  ;;  %v1503_v48 = vmul.f32 %v1471_v46, %v1439_v45  ;;  %v1423_v50 = vld [vmem:[#allocation2 + $0x30] sm:$0xff]  ;;  %v1520_v52 = vadd.f32 %v1488_v43, %v1392_v39  ;;  %v1422_v60 = vld [vmem:[#allocation2 + $0x68] sm:$0xff]  ;;  %v1437_v1 = vld [vmem:[#allocation2 + $0xe0] sm:$0xff] }
 0x1db   : > { %2324 = vmatprep.subr.mxu0 %v1537_v37  ;;  %v1455_v51 = vld [vmem:[%s3788_s12 + $0x30] sm:$0xff]  ;;  %v1454_v61 = vld [vmem:[%s3788_s12 + $0x28] sm:$0xff]  ;;  %v1501_v4 = vmul.f32 %v1469_v2, %v1437_v1  ;;  %v1389_v5 = vld [vmem:[#allocation11 + $0x20] sm:$0xff] }
 0x1dc   : > { %2325 = vmatpush3.msra.mxu0 %v1521_v42  ;;  %v1487_v53 = vmul.f32 %v1455_v51, %v1423_v50  ;;  %v1438_v55 = vld [vmem:[#allocation2 + $0x90] sm:$0xff]  ;;  %v1535_v57 = vadd.f32 %v1503_v48, %v1407_v44  ;;  %v1486_v63 = vmul.f32 %v1454_v61, %v1422_v60  ;;  %v1453_v7 = vld [vmem:[%s3788_s12 + $0x20] sm:$0xff]  ;;  %v1436_v11 = vld [vmem:[#allocation2 + $0xc8] sm:$0xff] }
 0x1dd   : > { %2326 = vmatprep.subr.mxu0 %v1536_v47  ;;  %v1502_v58 = vmul.f32 %v1470_v56, %v1438_v55  ;;  %v1421_v6 = vld [vmem:[#allocation2 + $0x50] sm:$0xff]  ;;  %v1533_v13 = vadd.f32 %v1501_v4, %v1405_v0  ;;  %v1420_v16 = vld [vmem:[#allocation2 + $0x18] sm:$0xff]  ;;  %v1403_v20 = vld [vmem:[#allocation11 + $0x90] sm:$0xff] }
 0x1de   : > { %2327 = vmatpush3.msra.mxu0 %v1520_v52  ;;  %v1519_v62 = vadd.f32 %v1487_v53, %v1391_v49  ;;  %v1518_v8 = vadd.f32 %v1486_v63, %v1390_v59  ;;  %v1485_v9 = vmul.f32 %v1453_v7, %v1421_v6  ;;  %v1404_v10 = vld [vmem:[#allocation11 + $0x98] sm:$0xff]  ;;  %v1435_v21 = vld [vmem:[#allocation2 + $0x40] sm:$0xff]  ;;  %v1419_v27 = vld [vmem:[#allocation2 + $0xd8] sm:$0xff] }
 0x1df   : > { %2328 = vmatprep.subr.mxu0 %v1535_v57  ;;  %v1534_v3 = vadd.f32 %v1502_v58, %v1406_v54  ;;  %v1468_v12 = vld [vmem:[%s3788_s12 + $0x98] sm:$0xff]  ;;  %v1467_v22 = vld [vmem:[%s3788_s12 + $0x90] sm:$0xff]  ;;  %v1402_v31 = vld [vmem:[#allocation11 + $0x88] sm:$0xff] }
 0x1e0   : > { %2329 = vmatpush3.msra.mxu0 %v1519_v62  ;;  %v1500_v14 = vmul.f32 %v1468_v12, %v1436_v11  ;;  %v1388_v15 = vld [vmem:[#allocation11 + $0x18] sm:$0xff]  ;;  %v1517_v18 = vadd.f32 %v1485_v9, %v1389_v5  ;;  %v1499_v24 = vmul.f32 %v1467_v22, %v1435_v21  ;;  %v1387_v26 = vld [vmem:[#allocation11 + $0x10] sm:$0xff]  ;;  %v1434_v32 = vld [vmem:[#allocation2 + $0x58] sm:$0xff] }
 0x1e1   : > { %2330 = vmatprep.subr.mxu0 %v1534_v3  ;;  %v1452_v17 = vld [vmem:[%s3788_s12 + $0x18] sm:$0xff]  ;;  %v1451_v28 = vld [vmem:[%s3788_s12 + $0x10] sm:$0xff]  ;;  %v1466_v33 = vld [vmem:[%s3788_s12 + $0x88] sm:$0xff] }
 0x1e2   : > { %2331 = vmatpush3.msra.mxu0 %v1518_v8  ;;  %v1484_v19 = vmul.f32 %v1452_v17, %v1420_v16  ;;  %v1532_v23 = vadd.f32 %v1500_v14, %v1404_v10  ;;  %v1483_v30 = vmul.f32 %v1451_v28, %v1419_v27  ;;  %v1531_v34 = vadd.f32 %v1499_v24, %v1403_v20  ;;  %v1386_v36 = vld [vmem:[#allocation11 + $0x8] sm:$0xff]  ;;  %v1401_v41 = vld [vmem:[#allocation11 + $0x80] sm:$0xff]  ;;  %v1384_v51 = vld [vmem:[#allocation8 + $0x8] sm:$0xff] }
 0x1e3   : > { %2332 = vmatprep.subr.mxu0 %v1533_v13  ;;  %v1498_v35 = vmul.f32 %v1466_v33, %v1434_v32  ;;  %v1418_v37 = vld [vmem:[#allocation2] sm:$0xff]  ;;  %v1433_v42 = vld [vmem:[#allocation2 + $0x38] sm:$0xff]  ;;  %v1417_v47 = vld [vmem:[#allocation2 + $0xb0] sm:$0xff]  ;;  %1790 = vmatprep.mubr.f32.mxu0 %v1384_v51 }
 0x1e4   : > { %2333 = vmatpush3.msra.mxu0 %v1517_v18  ;;  %v1516_v29 = vadd.f32 %v1484_v19, %v1388_v15  ;;  %v1450_v38 = vld [vmem:[%s3788_s12 + $0x8] sm:$0xff]  ;;  %v1515_v39 = vadd.f32 %v1483_v30, %v1387_v26  ;;  %v1465_v43 = vld [vmem:[%s3788_s12 + $0x80] sm:$0xff]  ;;  %v1565_v54 = vld [vmem:[#allocation17 + $0x78] sm:$0xff] }
 0x1e5   : > { %2334 = vmatprep.subr.mxu0 %v1532_v23  ;;  %v1482_v40 = vmul.f32 %v1450_v38, %v1418_v37  ;;  %v1530_v44 = vadd.f32 %v1498_v35, %v1402_v31  ;;  %v1497_v45 = vmul.f32 %v1465_v43, %v1433_v42  ;;  %v1385_v46 = vld [vmem:[#allocation11] sm:$0xff]  ;;  %v1383_v52 = vld [vmem:[#allocation8] sm:$0xff] }
 0x1e6   : > { %2335 = vmatpush3.msra.mxu0 %v1516_v29  ;;  %v1449_v48 = vld [vmem:[%s3788_s12] sm:$0xff]  ;;  %v1597_v56 = vld [vmem:[%s3812_s13 + $0x78] sm:$0xff]  ;;  %v1564_v59 = vld [vmem:[#allocation17 + $0x70] sm:$0xff]  ;;  %s1972_s12 = scalar_lea.sflag [#allocation30], %s3785_s26 }
 0x1e7   : > { %2336 = vmatprep.subr.mxu0 %v1531_v34  ;;  %v1514_v49 = vadd.f32 %v1482_v40, %v1386_v36  ;;  %v1481_v50 = vmul.f32 %v1449_v48, %v1417_v47  ;;  %v1529_v53 = vadd.f32 %v1497_v45, %v1401_v41  ;;  %v1581_v55 = vld [vmem:[#allocation4 + $0x58] sm:$0xff]  ;;  %v1580_v60 = vld [vmem:[#allocation4 + $0x28] sm:$0xff]  ;;  %v1579_v0 = vld [vmem:[#allocation4 + $0x30] sm:$0xff] }
 0x1e8   : > { %2337 = vmatpush3.msra.mxu0 %v1515_v39  ;;  %v1613_v58 = vmul.f32 %v1597_v56, %v1581_v55  ;;  %v1596_v61 = vld [vmem:[%s3812_s13 + $0x70] sm:$0xff]  ;;  %v1563_v63 = vld [vmem:[#allocation17 + $0x68] sm:$0xff]  ;;  %v1578_v4 = vld [vmem:[#allocation4 + $0x10] sm:$0xff] }
 0x1e9   : > { %2338 = vmatprep.subr.mxu0 %v1530_v44  ;;  %v1513_v57 = vadd.f32 %v1481_v50, %v1385_v46  ;;  %v1612_v62 = vmul.f32 %v1596_v61, %v1580_v60  ;;  %v1595_v1 = vld [vmem:[%s3812_s13 + $0x68] sm:$0xff]  ;;  %v1594_v5 = vld [vmem:[%s3812_s13 + $0x60] sm:$0xff]  ;;  %v1593_v10 = vld [vmem:[%s3812_s13 + $0x58] sm:$0xff] }
 0x1ea   : > { %2339 = vmatpush3.msra.mxu0 %v1514_v49  ;;  %v1629_v2 = vadd.f32 %v1613_v58, %v1565_v54  ;;  %v1611_v3 = vmul.f32 %v1595_v1, %v1579_v0  ;;  %v1562_v7 = vld [vmem:[#allocation17 + $0x60] sm:$0xff]  ;;  %v1610_v8 = vmul.f32 %v1594_v5, %v1578_v4  ;;  %v1577_v9 = vld [vmem:[#allocation4 + $0x20] sm:$0xff]  ;;  %v1592_v14 = vld [vmem:[%s3812_s13 + $0x50] sm:$0xff] }
 0x1eb   : > { %2340 = vmatprep.subr.mxu0 %v1529_v53  ;;  %v1628_v6 = vadd.f32 %v1612_v62, %v1564_v59  ;;  %v1609_v12 = vmul.f32 %v1593_v10, %v1577_v9  ;;  %v1576_v13 = vld [vmem:[#allocation4 + $0x18] sm:$0xff]  ;;  %v1561_v15 = vld [vmem:[#allocation17 + $0x58] sm:$0xff]  ;;  %v1575_v16 = vld [vmem:[#allocation4 + $0x60] sm:$0xff] }
 0x1ec   : > { %2341 = vmatpush3.msra.mxu0 %v1513_v57  ;;  %2380 = vmatpush3.msra.mxu1 %v1629_v2  ;;  %v1627_v11 = vadd.f32 %v1611_v3, %v1563_v63  ;;  %v1591_v17 = vld [vmem:[%s3812_s13 + $0x48] sm:$0xff]  ;;  %v1626_v18 = vadd.f32 %v1610_v8, %v1562_v7  ;;  %v1608_v19 = vmul.f32 %v1592_v14, %v1576_v13  ;;  %v1574_v21 = vld [vmem:[#allocation4 + $0x70] sm:$0xff]  ;;  %v1590_v22 = vld [vmem:[%s3812_s13 + $0x40] sm:$0xff] }
 0x1ed   : > { %1791 = vmatmul.mubr.f32.vlgmr.msra.gmra.mxu0 %v1383_v52  ;;  %2414 = vmatprep.subr.mxu0 %v3366_v25  ;;  %v1560_v20 = vld [vmem:[#allocation17 + $0x50] sm:$0xff]  ;;  %v1625_v23 = vadd.f32 %v1609_v12, %v1561_v15  ;;  %v1607_v24 = vmul.f32 %v1591_v17, %v1575_v16  ;;  %v1559_v26 = vld [vmem:[#allocation17 + $0x48] sm:$0xff]  ;;  %v1589_v28 = vld [vmem:[%s3812_s13 + $0x38] sm:$0xff]  ;;  %v1606_v30 = vmul.f32 %v1590_v22, %v1574_v21 }
 0x1ee   : > { %2381 = vmatprep.subr.mxu1 %v3366_v25  ;;  %v1573_v27 = vld [vmem:[#allocation4 + $0x38] sm:$0xff]  ;;  %v1624_v29 = vadd.f32 %v1608_v19, %v1560_v20  ;;  %v1572_v32 = vld [vmem:[#allocation4 + $0x40] sm:$0xff]  ;;  %v1588_v33 = vld [vmem:[%s3812_s13 + $0x30] sm:$0xff]  ;;  %2446 = vmatprep.mubr.msk.f32.mxu0 %vm3367_vm0, %v3366_v25 }
 0x1ef   : > { %2382 = vmatpush3.msra.mxu1 %v1628_v6  ;;  %v1558_v31 = vld [vmem:[#allocation17 + $0x40] sm:$0xff]  ;;  %v1623_v34 = vadd.f32 %v1607_v24, %v1559_v26  ;;  %v1605_v35 = vmul.f32 %v1589_v28, %v1573_v27  ;;  %v1557_v36 = vld [vmem:[#allocation17 + $0x38] sm:$0xff]  ;;  %v1587_v38 = vld [vmem:[%s3812_s13 + $0x28] sm:$0xff]  ;;  %v1604_v40 = vmul.f32 %v1588_v33, %v1572_v32 }
 0x1f0   : > { %2383 = vmatprep.subr.mxu1 %v3366_v25  ;;  %v1571_v37 = vld [vmem:[#allocation4 + $0x50] sm:$0xff]  ;;  %v1622_v39 = vadd.f32 %v1606_v30, %v1558_v31  ;;  %v1556_v41 = vld [vmem:[#allocation17 + $0x30] sm:$0xff]  ;;  %v1555_v44 = vld [vmem:[#allocation17 + $0x28] sm:$0xff] }
 0x1f1   : > { %2384 = vmatpush3.msra.mxu1 %v1627_v11  ;;  %v1621_v42 = vadd.f32 %v1605_v35, %v1557_v36  ;;  %v1603_v43 = vmul.f32 %v1587_v38, %v1571_v37  ;;  %v1620_v45 = vadd.f32 %v1604_v40, %v1556_v41  ;;  %v1570_v47 = vld [vmem:[#allocation4 + $0x8] sm:$0xff]  ;;  %v1586_v48 = vld [vmem:[%s3812_s13 + $0x20] sm:$0xff]  ;;  %v1585_v52 = vld [vmem:[%s3812_s13 + $0x18] sm:$0xff] }
 0x1f2   : > { %2385 = vmatprep.subr.mxu1 %v3366_v25  ;;  %v1602_v49 = vmul.f32 %v1586_v48, %v1570_v47  ;;  %v1554_v50 = vld [vmem:[#allocation17 + $0x20] sm:$0xff]  ;;  %v1553_v55 = vld [vmem:[#allocation17 + $0x18] sm:$0xff]  ;;  %v1552_v60 = vld [vmem:[#allocation17 + $0x10] sm:$0xff] }
 0x1f3   : > { %2386 = vmatpush3.msra.mxu1 %v1626_v18  ;;  %v1619_v46 = vadd.f32 %v1603_v43, %v1555_v44  ;;  %v1569_v51 = vld [vmem:[#allocation4 + $0x78] sm:$0xff]  ;;  %v1568_v56 = vld [vmem:[#allocation4 + $0x68] sm:$0xff]  ;;  %v1583_v62 = vld [vmem:[%s3812_s13 + $0x8] sm:$0xff] }
 0x1f4   : > { %2387 = vmatprep.subr.mxu1 %v3366_v25  ;;  %v1618_v53 = vadd.f32 %v1602_v49, %v1554_v50  ;;  %v1601_v54 = vmul.f32 %v1585_v52, %v1569_v51  ;;  %v1584_v57 = vld [vmem:[%s3812_s13 + $0x10] sm:$0xff]  ;;  %v1551_v1 = vld [vmem:[#allocation17 + $0x8] sm:$0xff]  ;;  %v1550_v6 = vld [vmem:[#allocation17] sm:$0xff] }
 0x1f5   : > { %2388 = vmatpush3.msra.mxu1 %v1625_v23  ;;  %v1600_v59 = vmul.f32 %v1584_v57, %v1568_v56  ;;  %v1567_v61 = vld [vmem:[#allocation4 + $0x48] sm:$0xff]  ;;  %v1566_v2 = vld [vmem:[#allocation4] sm:$0xff]  ;;  %v1582_v3 = vld [vmem:[%s3812_s13] sm:$0xff] }
 0x1f6   : > { %2389 = vmatprep.subr.mxu1 %v3366_v25  ;;  %v1617_v58 = vadd.f32 %v1601_v54, %v1553_v55  ;;  %v1599_v0 = vmul.f32 %v1583_v62, %v1567_v61  ;;  %v1598_v5 = vmul.f32 %v1582_v3, %v1566_v2  ;;  %v1650_v8 = vld [vmem:[#allocation22 + $0x78] sm:$0xff]  ;;  %v1666_v9 = vld [vmem:[#allocation6 + $0x60] sm:$0xff]  ;;  %v1679_v22 = vld [vmem:[%s3814_s21 + $0x60] sm:$0xff] }
 0x1f7   : > { %2390 = vmatpush3.msra.mxu1 %v1624_v29  ;;  %v1616_v63 = vadd.f32 %v1600_v59, %v1552_v60  ;;  %v1682_v10 = vld [vmem:[%s3814_s21 + $0x78] sm:$0xff]  ;;  %v1649_v12 = vld [vmem:[#allocation22 + $0x70] sm:$0xff]  ;;  %v1648_v16 = vld [vmem:[#allocation22 + $0x68] sm:$0xff] }
 0x1f8   : > { %2391 = vmatprep.subr.mxu1 %v3366_v25  ;;  %v1615_v4 = vadd.f32 %v1599_v0, %v1551_v1  ;;  %v1614_v7 = vadd.f32 %v1598_v5, %v1550_v6  ;;  %v1698_v11 = vmul.f32 %v1682_v10, %v1666_v9  ;;  %v1665_v13 = vld [vmem:[#allocation6 + $0x20] sm:$0xff]  ;;  %v1664_v17 = vld [vmem:[#allocation6 + $0x50] sm:$0xff]  ;;  %v1662_v27 = vld [vmem:[#allocation6 + $0x78] sm:$0xff]  ;;  %v1721_v10 = vlaneseq }
 0x1f9   : > { %2392 = vmatpush3.msra.mxu1 %v1623_v34  ;;  %v1681_v14 = vld [vmem:[%s3814_s21 + $0x70] sm:$0xff]  ;;  %v1680_v18 = vld [vmem:[%s3814_s21 + $0x68] sm:$0xff]  ;;  %v1663_v21 = vld [vmem:[#allocation6 + $0x30] sm:$0xff] }
 0x1fa   : > { %2393 = vmatprep.subr.mxu1 %v3366_v25  ;;  %v1697_v15 = vmul.f32 %v1681_v14, %v1665_v13  ;;  %v1714_v19 = vadd.f32 %v1698_v11, %v1650_v8  ;;  %v1696_v20 = vmul.f32 %v1680_v18, %v1664_v17  ;;  %v1647_v24 = vld [vmem:[#allocation22 + $0x60] sm:$0xff]  ;;  %v1695_v26 = vmul.f32 %v1679_v22, %v1663_v21  ;;  %v1678_v28 = vld [vmem:[%s3814_s21 + $0x58] sm:$0xff]  ;;  %v1677_v32 = vld [vmem:[%s3814_s21 + $0x50] sm:$0xff] }
 0x1fb   : > { %2394 = vmatpush3.msra.mxu1 %v1622_v39  ;;  %v1694_v30 = vmul.f32 %v1678_v28, %v1662_v27  ;;  %v1661_v31 = vld [vmem:[#allocation6 + $0x38] sm:$0xff]  ;;  %v1646_v33 = vld [vmem:[#allocation22 + $0x58] sm:$0xff]  ;;  %v1660_v34 = vld [vmem:[#allocation6] sm:$0xff]  ;;  %v1722_v14 = vshrl.u32 %v1721_v10, 7 }
 0x1fc   : > { %2395 = vmatprep.subr.mxu1 %v3366_v25  ;;  %v1713_v23 = vadd.f32 %v1697_v15, %v1649_v12  ;;  %2415 = vmatpush3.msra.mxu0 %v1714_v19  ;;  %v1712_v29 = vadd.f32 %v1696_v20, %v1648_v16  ;;  %v1676_v35 = vld [vmem:[%s3814_s21 + $0x48] sm:$0xff]  ;;  %v1711_v36 = vadd.f32 %v1695_v26, %v1647_v24  ;;  %v1645_v38 = vld [vmem:[#allocation22 + $0x50] sm:$0xff]  ;;  %v1675_v40 = vld [vmem:[%s3814_s21 + $0x40] sm:$0xff] }
 0x1fd   : > { %2396 = vmatpush3.msra.mxu1 %v1621_v42  ;;  %2416 = vmatprep.subr.mxu0 %v3366_v25  ;;  %v1693_v37 = vmul.f32 %v1677_v32, %v1661_v31  ;;  %v1659_v39 = vld [vmem:[#allocation6 + $0x28] sm:$0xff]  ;;  %v1710_v41 = vadd.f32 %v1694_v30, %v1646_v33  ;;  %v1692_v42 = vmul.f32 %v1676_v35, %v1660_v34  ;;  %v1644_v43 = vld [vmem:[#allocation22 + $0x48] sm:$0xff]  ;;  %v1643_v48 = vld [vmem:[#allocation22 + $0x40] sm:$0xff]  ;;  %v1723_v17 = vsub.s32 0, %v1722_v14 }
 0x1fe   : > { %2397 = vmatprep.subr.mxu1 %v3366_v25  ;;  %2417 = vmatpush3.msra.mxu0 %v1713_v23  ;;  %v1658_v44 = vld [vmem:[#allocation6 + $0x58] sm:$0xff]  ;;  %v1691_v47 = vmul.f32 %v1675_v40, %v1659_v39  ;;  %v1657_v49 = vld [vmem:[#allocation6 + $0x68] sm:$0xff]  ;;  %v1656_v54 = vld [vmem:[#allocation6 + $0x40] sm:$0xff] }
 0x1ff   : > { %2398 = vmatpush3.msra.mxu1 %v1620_v45  ;;  %2418 = vmatprep.subr.mxu0 %v3366_v25  ;;  %v1674_v45 = vld [vmem:[%s3814_s21 + $0x38] sm:$0xff]  ;;  %v1673_v50 = vld [vmem:[%s3814_s21 + $0x30] sm:$0xff]  ;;  %v1708_v51 = vadd.f32 %v1692_v42, %v1644_v43  ;;  %v1672_v55 = vld [vmem:[%s3814_s21 + $0x28] sm:$0xff] }
 0x200   : > { %2399 = vmatprep.subr.mxu1 %v3366_v25  ;;  %2419 = vmatpush3.msra.mxu0 %v1712_v29  ;;  %v1690_v52 = vmul.f32 %v1674_v45, %v1658_v44  ;;  %v1707_v56 = vadd.f32 %v1691_v47, %v1643_v48  ;;  %v1689_v57 = vmul.f32 %v1673_v50, %v1657_v49  ;;  %v1655_v59 = vld [vmem:[#allocation6 + $0x8] sm:$0xff]  ;;  %v1671_v60 = vld [vmem:[%s3814_s21 + $0x20] sm:$0xff]  ;;  %v1545_v15 = vld [vmem:[#allocation14] sm:$0x1] }
 0x201   : > { %2400 = vmatpush3.msra.mxu1 %v1619_v46  ;;  %2420 = vmatprep.subr.mxu0 %v3366_v25  ;;  %v1709_v46 = vadd.f32 %v1693_v37, %v1645_v38  ;;  %v1688_v62 = vmul.f32 %v1672_v55, %v1656_v54  ;;  %v1654_v0 = vld [vmem:[#allocation6 + $0x70] sm:$0xff]  ;;  %v1687_v3 = vmul.f32 %v1671_v60, %v1655_v59  ;;  %v1546_v11 = vld [vmem:[#allocation3] sm:$0x1]  ;;  %v1653_v24 = vld [vmem:[#allocation6 + $0x48] sm:$0xff]  ;;  %v1952_v54 = vand.u32 127, %v1721_v10 }
 0x202   : > { %2401 = vmatprep.subr.mxu1 %v3366_v25  ;;  %2421 = vmatpush3.msra.mxu0 %v1711_v36  ;;  %v1670_v1 = vld [vmem:[%s3814_s21 + $0x18] sm:$0xff]  ;;  %v1547_v12 = vld [vmem:[%s903_s7] sm:$0x1]  ;;  %v1669_v26 = vld [vmem:[%s3814_s21 + $0x10] sm:$0xff]  ;;  %s3368_s7 = smov [#allocation29]  }
 0x203   : > { %2402 = vmatpush3.msra.mxu1 %v1618_v53  ;;  %2422 = vmatprep.subr.mxu0 %v3366_v25  ;;  %v1642_v53 = vld [vmem:[#allocation22 + $0x38] sm:$0xff]  ;;  %v1686_v6 = vmul.f32 %v1670_v1, %v1654_v0  ;;  %v1548_v13 = vmul.f32 %v1547_v12, %v1546_v11  ;;  %v1685_v27 = vmul.f32 %v1669_v26, %v1653_v24  ;;  %v1637_v28 = vld [vmem:[#allocation22 + $0x10] sm:$0xff]  ;;  %v1668_v30 = vld [vmem:[%s3814_s21 + $0x8] sm:$0xff]  ;;  %vm1953_vm1 = vcmp.lt.s32.totalorder %v1952_v54, 10  ;;  %s3235_s19 = sshll.u32 %s3368_s7, 4  ;;  %s3236_s19 = int_to_ptr.vmem [resolvable:$false] %s3235_s19 }
 0x204   : > { %2403 = vmatprep.subr.mxu1 %v3366_v25  ;;  %2423 = vmatpush3.msra.mxu0 %v1710_v41  ;;  %v1706_v61 = vadd.f32 %v1690_v52, %v1642_v53  ;;  %v1652_v29 = vld [vmem:[#allocation6 + $0x10] sm:$0xff]  ;;  %v1636_v33 = vld [vmem:[#allocation22 + $0x8] sm:$0xff]  ;;  %v1632_v41 = vld [vmem:[%s906_s11] sm:$0x1]  ;;  %s4113_s11 = sld [smem:[#allocation53_spill]]  ;;  %s3237_s29 = scalar_lea.vmem %s3236_s19, 256 }
 0x205   : > { %2404 = vmatpush3.msra.mxu1 %v1617_v58  ;;  %2424 = vmatprep.subr.mxu0 %v3366_v25  ;;  %v1641_v58 = vld [vmem:[#allocation22 + $0x30] sm:$0xff]  ;;  %v1549_v16 = vadd.f32 %v1548_v13, %v1545_v15  ;;  %v1701_v31 = vadd.f32 %v1685_v27, %v1637_v28  ;;  %v1684_v32 = vmul.f32 %v1668_v30, %v1652_v29  ;;  %v1651_v34 = vld [vmem:[#allocation6 + $0x18] sm:$0xff]  ;;  %v1630_v43 = vld [vmem:[#allocation20] sm:$0x1]  ;;  %p3238_p5 = scmp.lt.s32.totalorder %s1999_s27, %s3236_s19  ;;  %p3239_p9 = scmp.lt.s32.totalorder %s3237_s29, %s3231_s8 }
 0x206   : > { %2405 = vmatprep.subr.mxu1 %v3366_v25  ;;  %2425 = vmatpush3.msra.mxu0 %v1709_v46  ;;  %v1705_v2 = vadd.f32 %v1689_v57, %v1641_v58  ;;  %v1667_v35 = vld [vmem:[%s3814_s21] sm:$0xff]  ;;  %v1631_v40 = vld [vmem:[#allocation5] sm:$0x1]  ;;  %v1716_v50 = vld [vmem:[#allocation7] sm:$0x1] }
 0x207   : > { %2406 = vmatpush3.msra.mxu1 %v1616_v63  ;;  %2426 = vmatprep.subr.mxu0 %v3366_v25  ;;  %v1640_v63 = vld [vmem:[#allocation22 + $0x28] sm:$0xff]  ;;  %v1724_v19 = vrot.slane %v1549_v16, %v1723_v17  ;;  %v1700_v36 = vadd.f32 %v1684_v32, %v1636_v33  ;;  %v1683_v37 = vmul.f32 %v1667_v35, %v1651_v34  ;;  %v1635_v38 = vld [vmem:[#allocation22] sm:$0xff]  ;;  %p3240_p6 = por %p3239_p9, %p3238_p5 }
 0x208   : > { %2407 = vmatprep.subr.mxu1 %v3366_v25  ;;  %2427 = vmatpush3.msra.mxu0 %v1708_v51  ;;  %v1704_v5 = vadd.f32 %v1688_v62, %v1640_v63  ;;  %v1633_v42 = vmul.f32 %v1632_v41, %v1631_v40 }
 0x209   : > { %2408 = vmatpush3.msra.mxu1 %v1615_v4  ;;  %2428 = vmatprep.subr.mxu0 %v3366_v25  ;;  %v1639_v4 = vld [vmem:[#allocation22 + $0x20] sm:$0xff]  ;;  %v1699_v39 = vadd.f32 %v1683_v37, %v1635_v38  ;;  %p3241_p12 = pnand %p3240_p6, %p3234_p1 }
 0x20a   : > { %2409 = vmatprep.subr.mxu1 %v3366_v25  ;;  %2429 = vmatpush3.msra.mxu0 %v1707_v56  ;;  %v1703_v8 = vadd.f32 %v1687_v3, %v1639_v4  ;;  %v1634_v44 = vadd.f32 %v1633_v42, %v1630_v43  ;;  %v1715_v52 = vld [vmem:[%s4113_s11] sm:$0x1] }
 0x20b   : > { %2410 = vmatpush3.msra.mxu1 %v1614_v7  ;;  %2430 = vmatprep.subr.mxu0 %v3366_v25  ;;  %v1638_v7 = vld [vmem:[#allocation22 + $0x18] sm:$0xff] }
 0x20c   : > { %2431 = vmatpush3.msra.mxu0 %v1706_v61  ;;  %v1702_v9 = vadd.f32 %v1686_v6, %v1638_v7  ;;  %v1801_v45 = vrot.slane %v1634_v44, %v1723_v17 }
 0x20d   : > { %2432 = vmatprep.subr.mxu0 %v3366_v25 }
 0x20e   : > { %2433 = vmatpush3.msra.mxu0 %v1705_v2 }
 0x20f   : > { %2434 = vmatprep.subr.mxu0 %v3366_v25 }
 0x210   : > { %2435 = vmatpush3.msra.mxu0 %v1704_v5 }
 0x211   : > { %2436 = vmatprep.subr.mxu0 %v3366_v25 }
 0x212   : > { %2437 = vmatpush3.msra.mxu0 %v1703_v8 }
 0x213   : > { %2438 = vmatprep.subr.mxu0 %v3366_v25 }
 0x214   : > { %2439 = vmatpush3.msra.mxu0 %v1702_v9 }
 0x215   : > { %2440 = vmatprep.subr.mxu0 %v3366_v25 }
 0x216   : > { %2441 = vmatpush3.msra.mxu0 %v1701_v31 }
 0x217   : > { %2442 = vmatprep.subr.mxu0 %v3366_v25 }
 0x218   : > { %2443 = vmatpush3.msra.mxu0 %v1700_v36 }
 0x219   : > { %2444 = vmatprep.subr.mxu0 %v3366_v25  ;;  %v1717_v25 = vld [vmem:[%s909_s2] sm:$0x1] }
 0x21a   : > { %2445 = vmatpush3.msra.mxu0 %v1699_v39  ;;  %v1718_v51 = vmul.f32 %v1717_v25, %v1716_v50 }
 0x21c   : > { %v1719_v53 = vadd.f32 %v1718_v51, %v1715_v52 }
 0x21e   : > { %v1878_v55 = vrot.slane %v1719_v53, %v1723_v17 }
 0x2ad   : > { %v2342_v18 = vpop.f32.mrf.mxu0 }
 0x2af   : > { %v2343_v20 = vpop.f32.mrf.mxu0 }
 0x2b0   : > { %v2344_v21 = vadd.f32 %v2343_v20, %v2342_v18 }
 0x2b2   : > { %v1793_v22 = vadd.f32 %v2344_v21, %v1724_v19 }
 0x2b4   : > { %v1796_v23 = vmax.f32 %v1793_v22, 0.0 }
 0x2b6   : > { %2412 = vmatmul.mubr.f32.vlgmr.msra.gmra.mxu1 %v1796_v23 }
 0x376   : > { %v1869_v46 = vpop.f32.mrf.mxu1 }
 0x377   : > { %v1870_v47 = vadd.f32 %v1869_v46, %v1801_v45 }
 0x378   : > { %v2413_v48 = vpop.f32.mrf.mxu1 }
 0x379   : > { %v1873_v49 = vmax.f32 %v1870_v47, 0.0 }
 0x37b   : > { %2447 = vmatmul.mubr.f32.vlgmr.msra.gmra.mxu0 %v1873_v49 }
 0x43b   : > { %v1946_v56 = vpop.f32.mrf.mxu0 }
 0x43c   : > { %v1947_v57 = vadd.f32 %v1946_v56, %v1878_v55 }
 0x43d   : > { %v2448_v58 = vpop.f32.mrf.mxu0 }
 0x43e   : > { %1950 = vst [vmem:[%s3818_s4] sm:$0xff] %v1947_v57  ;;  %v1954_v59 = vsel %vm1953_vm1, %v1947_v57, -1e+30 }
 0x43f   : > { %1955 = vmax.xlane.f32.xlu0 %v1954_v59 }
 0x4c8   : > { %v1956_v60 = vpop.xlane.xlu0 %1955 }
 0x4c9   : > { %v1957_v61 = vsub.f32 %v1954_v59, %v1956_v60 }
 0x4cb   : > { %v1958_v62 = vmul.f32 1.442695, %v1957_v61 }
 0x4cd   : > { %2883 = vpow2.f32 %v1958_v62 }
 0x4da   : > { %v2884_v63 = vpop.eup %2883 }
 0x4db   : > { %1960 = vadd.xlane.f32.xlu0 %v2884_v63 }
 0x4dc   : > { %3244 = shalt.err (!%p3241_p12)
}
 0x4dd   : > { %s3245_s20 = scalar_lea.hbm %s1996_s0, 128  ;;  %s3249_s13 = scalar_lea.hbm %s4115_s30, 512 }
 0x4de   : > { %p3246_p3 = scmp.ne.s32.totalorder %s1996_s0, %s3245_s20  ;;  %p3250_p13 = scmp.lt.s32.totalorder %s1996_s0, %s4115_s30 }
 0x4df   : > { %p3251_p10 = scmp.lt.s32.totalorder %s3249_s13, %s3245_s20 }
 0x4e0   : > { %p3247_p7 = pnand %p3246_p3, %p4116_p8 }
 0x4e1   : > { %p3252_p0 = por %p3251_p10, %p3250_p13 }
 0x4e2   : > { %p3248_p4 = pneg %p3247_p7 }
 0x4e4   : > { %p3253_p2 = pnand %p3252_p0, %p3248_p4 }
 0x4e6   : > { %3256 = shalt.err (!%p3253_p2)
}
 0x4e7   : > { %2496 = dma.vmem_to_hbm [thread:$0]  (%p4116_p8), %s1999_s27, 128, %s1996_s0, %s1972_s12  }
 0x4e8   : > { %s1985_s11 = sshll.u32 %s3816_s18, 4  ;;  %s4117_s8 = sld [smem:[#allocation58_spill]]  ;;  %s1986_s11 = int_to_ptr.vmem [resolvable:$true] %s1985_s11 }
 0x4e9   : > { %s1967_s19 = scalar_lea.sflag [#allocation10], %s3785_s26  ;;  %s3257_s29 = scalar_lea.vmem %s1986_s11, 128 }
 0x4ea   : > { %p3258_p11 = scmp.ne.s32.totalorder %s1986_s11, %s3257_s29  ;;  %s3369_s0 = smov [#allocation28]  }
 0x4eb   : > { %s3261_s27 = sshll.u32 %s3369_s0, 4  ;;  %s3262_s27 = int_to_ptr.vmem [resolvable:$false] %s3261_s27 }
 0x4ec   : > { %p3259_p1 = pnand %p3258_p11, %p4116_p8  ;;  %s3263_s12 = scalar_lea.vmem %s3262_s27, 256 }
 0x4ed   : > { %p3264_p9 = scmp.lt.s32.totalorder %s1986_s11, %s3262_s27  ;;  %p3265_p6 = scmp.lt.s32.totalorder %s3263_s12, %s3257_s29 }
 0x4ee   : > { %s1983_s7 = scalar_lea.hbm %s4117_s8, %s2303_s28  ;;  %p3260_p5 = pneg %p3259_p1 }
 0x4ef   : > { %p3266_p12 = por %p3265_p6, %p3264_p9 }
 0x4f1   : > { %p3267_p3 = pnand %p3266_p12, %p3260_p5 }
 0x564   : > { %v1961_v0 = vpop.xlane.xlu0 %1960 }
 0x565   : > { %2885 = vlog2.f32 %v1961_v0 }
 0x572   : > { %v2886_v1 = vpop.eup %2885 }
 0x573   : > { %v1963_v2 = vmul.f32 0.6931472, %v2886_v1 }
 0x575   : > { %v1964_v3 = vsub.f32 %v1957_v61, %v1963_v2 }
 0x577   : > { %1965 = vst [vmem:[%s3816_s18] sm:$0xff] %v1964_v3 }
 0x578   : > { %3270 = shalt.err (!%p3267_p3)
}
 0x579   : > { %s3271_s3 = scalar_lea.hbm %s1983_s7, 128  ;;  %s3275_s28 = scalar_lea.hbm %s4117_s8, 512 }
 0x57a   : > { %p3272_p7 = scmp.ne.s32.totalorder %s1983_s7, %s3271_s3  ;;  %p3276_p10 = scmp.lt.s32.totalorder %s1983_s7, %s4117_s8 }
 0x57b   : > { %p3277_p0 = scmp.lt.s32.totalorder %s3275_s28, %s3271_s3 }
 0x57c   : > { %p3273_p4 = pnand %p3272_p7, %p4116_p8 }
 0x57d   : > { %p3278_p2 = por %p3277_p0, %p3276_p10 }
 0x57e   : > { %p3274_p13 = pneg %p3273_p4 }
 0x580   : > { %p3279_p11 = pnand %p3278_p2, %p3274_p13 }
 0x582   : > { %3282 = shalt.err (!%p3279_p11)
}
 0x583   : > { %2495 = dma.vmem_to_hbm [thread:$0]  (%p4116_p8), %s1986_s11, 128, %s1983_s7, %s1967_s19  }
 0x584 PF: > { %s4118_s16 = sld [smem:[#allocation40_spill]]  ;;  %p2568_p1 = scmp.ge.s32.totalorder %s3349_s24, 2 }
 0x585   : > { %s4119_s13 = sld [smem:[#allocation44_spill]] }
 0x58a   : > { %s2010_s21 = sand.u32 1, %s4118_s16  }
 0x58b   : > { %p4120_p5 = scmp.ne.s32.totalorder %s4119_s13, 0  ;;  %s2011_s1 = scalar_lea.sflag [#allocation10], %s2010_s21 }
 0x58d   : > { %p2541_p9 = pnand %p2568_p1, %p4120_p5 }
 0x58f   : > { %p2542_p6 = pneg %p2541_p9 }
 0x591   : > { %3328 = dma.done.wait (%p2542_p6), %s2011_s1, 128  }
 0x592   : > { %3330 = vsyncadd (%p2542_p6), %s2011_s1, 4294967168  ;;  %s2020_s2 = scalar_lea.sflag [#allocation30], %s2010_s21 }
 0x593   : > { %3332 = dma.done.wait (%p2542_p6), %s2020_s2, 128  }
 0x594   : > { %3334 = vsyncadd (%p2542_p6), %s2020_s2, 4294967168  ;;  %s4121_s24 = sld [smem:[#allocation41_spill]]  ;;  %s4123_s1 = smov %s3341_s22 }
 0x595   : > { %s4122_s5 = sld [smem:[#allocation42_spill]]  ;;  %s4124_s22 = smov %s3345_s23 }
 0x59a   : > { %p40_p8 = scmp.ge.s32.totalorder %s4121_s24, 6  }
 0x59b   : > { %s4125_s23 = smov %s4122_s5 }
 0x59c   :  { %42 = sbr.rel (!%p40_p8) target bundleno = 27 (0x1b), region = 232 }
 0x5a1   :  { %2025 = vsyncpa [#allocation9], 1 }
 0x5a2   :  { %2027 = vsyncpa [#allocation9 + $0x1], 1 }
 0x5a3   :  { %2028 = vsyncpa [#allocation12], 1 }
 0x5a4   :  { %2029 = vsyncpa [#allocation15], 1 }
 0x5a5   :  { %2030 = vsyncpa [#allocation18], 1 }
 0x5a6   :  { %2031 = vsyncpa [#allocation21], 1 }
 0x5a7   :  { %2032 = vsyncpa [#allocation24], 1 }
 0x5a8   :  { %2033 = vsyncpa [#allocation10], 1 }
 0x5a9   :  { %2035 = vsyncpa [#allocation10 + $0x1], 1 }
 0x5aa   :  { %2036 = vsyncpa [#allocation30], 1 }
 0x5ab   :  { %2038 = vsyncpa [#allocation30 + $0x1], 1 }

</bundles_post_ra>
